<compile_context>
chip_gen: v7x
topology: tpu7x:2x2x1
jax: 0.10.0
libtpu: 0.0.40
codegen_flags: <defaults>
</compile_context>

<pallas_src>
import functools
import math

import jax
import jax.numpy as jnp
from jax.experimental import pallas as pl
from jax.experimental.pallas import tpu as pltpu

SCALES = (128.0, 256.0, 512.0)
ASPECT_RATIOS = (0.5, 1.0, 2.0)
NUM_ANCHORS = len(SCALES) * len(ASPECT_RATIOS)          # 9
BBOX_XFORM_CLIP = math.log(1000.0 / 16.0)               # torchvision clamp on dw/dh


def _round_up(x, m):
    return (x + m - 1) // m * m


def _vmem_budget_bytes():
    """Per-generation scoped-VMEM budget with headroom (~48 MiB on v7x's
    64 MiB physical, ~96 MiB on v5e/v6e's 128 MiB)."""
    cap = 64 << 20
    try:
        cap = int(getattr(pltpu.get_tpu_info(), "vmem_capacity_bytes", cap))
    except Exception:
        pass
    return min(cap * 3 // 4, 100 << 20)


def _head_vmem_need(TH, W, C, HP):
    """VMEM estimate for one grid step of the head kernel: double-buffered
    bf16 halo-window input + bf16 output block + resident weights + im2col
    temporaries."""
    halo = 2 * (TH + 2) * (W + 2) * C * 2
    outb = 2 * TH * W * HP * 2
    wts = 2 * (9 * C * C * 2 + C * HP * 2 + C * 4 + HP * 4)
    tmp = TH * W * 9 * C * 2 + TH * W * (C + HP) * 4 + TH * W * HP * 4
    return halo + outb + wts + tmp


def _choose_row_block(H, W, C, HP, vmem_budget, target_rows=512):
    """Pick TH such that: TH divides H; the output block's second-to-last dim
    (TH*W) satisfies the (8,128) rule (TH*W % 8 == 0, or TH == H so the block
    equals the full dim); the per-step VMEM need fits the budget; and TH*W is
    at least `target_rows` (preferring a multiple of 256) so the MXU M dim
    stays full and the ~0.35 us per-grid-step overhead is amortized."""
    legal = [th for th in range(1, H + 1)
             if H % th == 0 and ((th * W) % 8 == 0 or th == H)]
    fitting = [th for th in legal if _head_vmem_need(th, W, C, HP) <= vmem_budget]
    if not fitting:
        fitting = [min(legal)]      # nothing fits: take the smallest legal tile
    for pred in (lambda th: th * W >= target_rows and (th * W) % 256 == 0,
                 lambda th: th * W >= target_rows):
        sel = [th for th in fitting if pred(th)]
        if sel:
            return min(sel)
    return max(fitting)


# --------------------------------------------------------------------------
# Kernel 1: 3x3 conv (pad=1) + ReLU + fused cls/bbox 1x1 heads
# --------------------------------------------------------------------------
def _rpn_head_kernel(x_ref, w9_ref, b33_ref, wh_ref, bh_ref, out_ref, *, TH, W, C):
    rows = x_ref[0]                                       # (TH+2, W+2, C) bf16 halo

    # im2col along the contraction dim: build (TH, W, 9C) once per row block.
    # TODO(synk): on v5e the kx=1,2 column shifts are sublane-misaligned vreg
    # copies that compete with the single vst slot; pltpu.roll(axis=1) would
    # move them to the XLU slot if that becomes the binding unit.
    taps = []
    for ky in range(3):
        r = rows[ky:ky + TH]                              # (TH, W+2, C)
        for kx in range(3):
            taps.append(r[:, kx:kx + W, :])               # (TH, W, C)
    patch = jnp.concatenate(taps, axis=-1)                # (TH, W, 9C), bf16
    patch = patch.reshape(TH * W, 9 * C)

    # Single long-K MXU matmul (K = 9C amortizes weight pushes / result pops).
    acc = jnp.dot(patch, w9_ref[...], preferred_element_type=jnp.float32)
    feat = jnp.maximum(acc + b33_ref[...], 0.0)           # ReLU, (TH*W, C) f32

    # Fused cls + bbox 1x1 heads; output lanes padded to a dense 128.
    heads = jnp.dot(feat.astype(jnp.bfloat16), wh_ref[...],
                    preferred_element_type=jnp.float32) + bh_ref[...]
    out_ref[0, :, :] = heads.astype(out_ref.dtype)


def _fused_head_weights(params):
    C, A = params["wc"].shape
    HP = _round_up(5 * A, 128)
    wh = jnp.zeros((C, HP), jnp.float32)
    wh = wh.at[:, :A].set(params["wc"]).at[:, A:5 * A].set(params["wb"])
    bh = jnp.zeros((HP,), jnp.float32)
    bh = bh.at[:A].set(params["bc"]).at[A:5 * A].set(params["bb"])
    return wh.astype(jnp.bfloat16), bh.reshape(1, HP)


def rpn_heads(feat_nchw, params):
    """Returns a (B, H*W, HP) bf16 slab: lanes [0:A] = objectness logits,
    lanes [A:5A] = box deltas in channel order c = anchor*4 + coord."""
    B, C, H, W = feat_nchw.shape
    A = NUM_ANCHORS
    HP = _round_up(5 * A, 128)
    budget = _vmem_budget_bytes()
    TH = _choose_row_block(H, W, C, HP, budget)
    HB = H // TH

    x = jnp.transpose(feat_nchw, (0, 2, 3, 1)).astype(jnp.bfloat16)   # NHWC, bf16
    x_pad = jnp.pad(x, ((0, 0), (1, 1), (1, 1), (0, 0)))              # (B,H+2,W+2,C)
    # Pre-blocked (TH+2)-row halo windows (wrapper-side layout plumbing): each
    # grid step's window is contiguous in HBM, so the auto-pipeline only keeps
    # two small halo blocks resident instead of the whole padded map.  Costs
    # ~one extra XLA read+write of the feature map; the conv is compute-bound
    # (AI ~ 9C flop/byte) so this is far from the HBM roofline.
    row_idx = jnp.arange(HB)[:, None] * TH + jnp.arange(TH + 2)[None, :]
    x_blk = x_pad[:, row_idx].reshape(B * HB, TH + 2, W + 2, C)

    w9 = params["w33"].reshape(9 * C, C).astype(jnp.bfloat16)         # (ky,kx,cin)-major
    b33 = params["b33"].reshape(1, C).astype(jnp.float32)
    wh, bh = _fused_head_weights(params)

    need = _head_vmem_need(TH, W, C, HP)
    vmem_limit = int(max(min(budget, max(2 * need, 16 << 20)), need + (2 << 20)))

    flops = 2 * B * H * W * C * (9 * C + HP)
    bytes_accessed = (x_blk.size * 2 + w9.size * 2 + wh.size * 2
                      + (b33.size + bh.size) * 4 + B * H * W * HP * 2)

    kern = functools.partial(_rpn_head_kernel, TH=TH, W=W, C=C)
    slab = pl.pallas_call(
        kern,
        out_shape=jax.ShapeDtypeStruct((B, H * W, HP), jnp.bfloat16),
        grid=(B, HB),
        in_specs=[
            pl.BlockSpec((1, TH + 2, W + 2, C), lambda b, h: (b * HB + h, 0, 0, 0)),
            pl.BlockSpec((9 * C, C), lambda b, h: (0, 0)),
            pl.BlockSpec((1, C), lambda b, h: (0, 0)),
            pl.BlockSpec((C, HP), lambda b, h: (0, 0)),
            pl.BlockSpec((1, HP), lambda b, h: (0, 0)),
        ],
        out_specs=pl.BlockSpec((1, TH * W, HP), lambda b, h: (b, h, 0)),
        compiler_params=pltpu.CompilerParams(
            dimension_semantics=("arbitrary", "parallel"),
            vmem_limit_bytes=vmem_limit),
        cost_estimate=pl.CostEstimate(flops=flops, transcendentals=0,
                                      bytes_accessed=bytes_accessed),
    )(x_blk, w9, b33, wh, bh)
    return slab


# --------------------------------------------------------------------------
# Kernel 2: box decode + clamp-to-image + sigmoid(objectness), tiled over N
# --------------------------------------------------------------------------
def _decode_kernel(d_ref, a_ref, c_ref, prop_ref, score_ref, *, img_h, img_w):
    a = a_ref[...]                                        # (4, TN) anchors, f32
    d = d_ref[...].astype(jnp.float32)                    # (4, TN) deltas (bf16 in)
    ax1, ay1, ax2, ay2 = a[0:1], a[1:2], a[2:3], a[3:4]
    dx, dy = d[0:1], d[1:2]
    # torchvision-parity clamp so exp() cannot overflow for large regressor outputs.
    dw = jnp.minimum(d[2:3], BBOX_XFORM_CLIP)
    dh = jnp.minimum(d[3:4], BBOX_XFORM_CLIP)
    w = ax2 - ax1
    h = ay2 - ay1
    cx = ax1 + 0.5 * w
    cy = ay1 + 0.5 * h
    pcx = w * dx + cx
    pcy = h * dy + cy
    pw = jnp.exp(dw) * w
    ph = jnp.exp(dh) * h
    x1 = jnp.clip(pcx - 0.5 * pw, 0.0, img_w)
    y1 = jnp.clip(pcy - 0.5 * ph, 0.0, img_h)
    x2 = jnp.clip(pcx + 0.5 * pw, 0.0, img_w)
    y2 = jnp.clip(pcy + 0.5 * ph, 0.0, img_h)
    prop_ref[...] = jnp.concatenate([x1, y1, x2, y2], axis=0)
    score_ref[...] = jax.nn.sigmoid(c_ref[...].astype(jnp.float32))


def decode_proposals(deltas_t, anchors_t, logits_t, image_shape, tn=32768):
    """deltas_t (4, N) bf16/f32, anchors_t (4, N) f32, logits_t (1, N).
    Coord-major, lane-dense; 32K-lane tiles (mem-bound elementwise)."""
    N = deltas_t.shape[1]
    tn = min(tn, _round_up(N, 128))
    Np = _round_up(N, tn)
    if Np != N:
        pad = ((0, 0), (0, Np - N))
        deltas_t = jnp.pad(deltas_t, pad)
        anchors_t = jnp.pad(anchors_t, pad)
        logits_t = jnp.pad(logits_t, pad)
    img_h, img_w = image_shape[-2:]
    kern = functools.partial(_decode_kernel, img_h=float(img_h), img_w=float(img_w))
    prop_t, score_t = pl.pallas_call(
        kern,
        out_shape=(jax.ShapeDtypeStruct((4, Np), jnp.float32),
                   jax.ShapeDtypeStruct((1, Np), jnp.float32)),
        grid=(Np // tn,),
        in_specs=[pl.BlockSpec((4, tn), lambda i: (0, i)),
                  pl.BlockSpec((4, tn), lambda i: (0, i)),
                  pl.BlockSpec((1, tn), lambda i: (0, i))],
        out_specs=(pl.BlockSpec((4, tn), lambda i: (0, i)),
                   pl.BlockSpec((1, tn), lambda i: (0, i))),
        compiler_params=pltpu.CompilerParams(dimension_semantics=("parallel",)),
    )(deltas_t, anchors_t, logits_t)
    return prop_t[:, :N], score_t[0, :N]


# --------------------------------------------------------------------------
# Plain-JAX glue (anchor generation, top-k selection, parameter init)
# --------------------------------------------------------------------------
def generate_anchors_t(image_shape, feat_shape, dtype=jnp.float32):
    """Anchors generated directly in coord-major (4, H*W*A) layout."""
    grid_h, grid_w = feat_shape[-2:]
    image_h, image_w = image_shape[-2:]
    stride_h = image_h // grid_h
    stride_w = image_w // grid_w
    scale = jnp.asarray(SCALES, dtype)
    ar = jnp.asarray(ASPECT_RATIOS, dtype)
    h_ratio = jnp.sqrt(ar)
    w_ratio = 1.0 / h_ratio
    ws = (w_ratio[:, None] * scale[None, :]).reshape(-1)          # (A,)
    hs = (h_ratio[:, None] * scale[None, :]).reshape(-1)          # (A,)
    base = jnp.round(jnp.stack([-ws, -hs, ws, hs], axis=0) / 2.0)  # (4, A)
    shift_x = jnp.arange(grid_w, dtype=dtype) * stride_w
    shift_y = jnp.arange(grid_h, dtype=dtype) * stride_h
    sy, sx = jnp.meshgrid(shift_y, shift_x, indexing="ij")
    sx = sx.reshape(-1)
    sy = sy.reshape(-1)
    shifts = jnp.stack([sx, sy, sx, sy], axis=0)                  # (4, HW)
    anchors_t = (shifts[:, :, None] + base[:, None, :]).reshape(4, -1)
    return anchors_t                                              # (4, HW*A)


def init_params(key, C):
    A = NUM_ANCHORS
    k1, k2, k3 = jax.random.split(key, 3)
    return dict(
        # rpn_conv weight stored as (3, 3, Cin, Cout); from a PyTorch
        # (Cout, Cin, 3, 3) tensor use w.transpose(2, 3, 1, 0).
        w33=jax.random.normal(k1, (3, 3, C, C), jnp.float32) * 0.02,
        b33=jnp.zeros((C,), jnp.float32),
        # cls_layer 1x1: (Cin, A); from PyTorch (A, Cin, 1, 1) use w[:, :, 0, 0].T
        wc=jax.random.normal(k2, (C, A), jnp.float32) * 0.02,
        bc=jnp.zeros((A,), jnp.float32),
        # bbox_reg_layer 1x1: (Cin, 4A) with output channel c = anchor*4 + coord
        # (PyTorch's native channel order), so slab[..., A:5A].reshape(-1, 4)
        # matches view(B, A, 4, H, W).permute(0, 3, 4, 1, 2).reshape(-1, 4).
        wb=jax.random.normal(k3, (C, 4 * A), jnp.float32) * 0.02,
        bb=jnp.zeros((4 * A,), jnp.float32),
    )


def rpn_forward(image, feat, params):
    """Inference path of RPN.forward (target is None)."""
    B, C, H, W = feat.shape
    A = NUM_ANCHORS

    slab = rpn_heads(feat, params)                        # (B, H*W, HP) bf16
    anchors_t = generate_anchors_t(image.shape, feat.shape)
    if B > 1:
        anchors_t = jnp.tile(anchors_t, (1, B))

    cls_logits = slab[:, :, :A]                           # (B, HW, A)
    cls_scores = cls_logits.astype(jnp.float32).reshape(-1, 1)   # permute(0,2,3,1).reshape(-1,1)
    # Deltas are emitted in channel order anchor*4+coord, so (N, 4) is a
    # contiguous reshape; the (N,4)->(4,N) layout swap is one XLA pass on bf16
    # kept outside the kernel.
    deltas_t = slab[:, :, A:5 * A].reshape(-1, 4).T       # (4, N)
    logits_t = cls_logits.reshape(1, -1)                  # (1, N)

    proposals_t, scores = decode_proposals(deltas_t, anchors_t, logits_t,
                                           image.shape)

    # filter_proposals: sigmoid + clamp done in the decode kernel; top-k here.
    # Gather the kept columns before transposing (avoids a full Nx4 transpose).
    N = scores.shape[0]
    k = min(10000, N)
    topk_scores, topk_idx = jax.lax.top_k(scores, k)
    topk_props = proposals_t[:, topk_idx].T               # (k, 4)
    # TODO(synk): torchvision greedy NMS (iou 0.7) is sequential / data-dependent
    # with no clean Pallas equivalent — skipped; proposals are returned score-sorted.
    keep = min(2000, k)
    return {
        "proposals": topk_props[:keep],
        "scores": topk_scores[:keep],
        "cls_scores": cls_scores,
    }


if __name__ == "__main__":
    key = jax.random.PRNGKey(0)
    k_feat, k_par = jax.random.split(key)

    # Small shapes: batch=1, in_channels=128, feature map 16x16, image 128x128.
    B, C, H, W = 1, 128, 16, 16
    image = jnp.zeros((B, 3, 128, 128), jnp.float32)      # only its shape is used
    feat = jax.random.normal(k_feat, (B, C, H, W), jnp.float32)
    params = init_params(k_par, C)

    out = jax.jit(lambda im, f: rpn_forward(im, f, params))(image, feat)
    jax.block_until_ready(out)

    assert out["proposals"].shape == (min(2000, B * H * W * NUM_ANCHORS), 4)
    assert out["cls_scores"].shape == (B * H * W * NUM_ANCHORS, 1)
    assert bool(jnp.all(jnp.isfinite(out["proposals"])))
    assert bool(jnp.all(jnp.isfinite(out["scores"])))
    print("KERNEL_OK")
</pallas_src>

<mosaic_0001>
module attributes {stable_mosaic.version = 11 : i64} {
  func.func private @main(%arg0: i32) attributes {dimension_semantics = [#tpu.dimension_semantics<core_parallel>], iteration_bounds = array<i64: 2>, tpu.core_type = #tpu.core_type<sc_scalar_subcore>, window_params = []} {
    return
  }
}

module attributes {stable_mosaic.version = 11 : i64} {
  func.func private @main(%arg0: i32) attributes {dimension_semantics = [#tpu.dimension_semantics<core_parallel>], iteration_bounds = array<i64: 2>, tpu.core_type = #tpu.core_type<sc_scalar_subcore>, window_params = []} {
    return
  }
}

module attributes {stable_mosaic.version = 11 : i64} {
  func.func @_rpn_head_kernel(%arg0: i32, %arg1: i32, %arg2: memref<1x18x18x128xbf16, #tpu.memory_space<vmem>>, %arg3: memref<1152x128xbf16, #tpu.memory_space<vmem>>, %arg4: memref<1x128xf32, #tpu.memory_space<vmem>>, %arg5: memref<128x128xbf16, #tpu.memory_space<vmem>>, %arg6: memref<1x128xf32, #tpu.memory_space<vmem>>, %arg7: memref<1x256x128xbf16, #tpu.memory_space<vmem>>) attributes {dimension_semantics = [#tpu.dimension_semantics<arbitrary>, #tpu.dimension_semantics<parallel>], iteration_bounds = array<i64: 1, 1>, scalar_prefetch = 0 : i64, scratch_operands = 0 : i64, tpu.core_type = #tpu.core_type<tc>, window_params = [{transform_indices = @transform_0, window_bounds = array<i64: 1, 18, 18, 128>}, {pipeline_mode = #tpu.pipeline_mode<synchronous>, transform_indices = @transform_1, window_bounds = array<i64: 1152, 128>}, {pipeline_mode = #tpu.pipeline_mode<synchronous>, transform_indices = @transform_2, window_bounds = array<i64: 1, 128>}, {pipeline_mode = #tpu.pipeline_mode<synchronous>, transform_indices = @transform_3, window_bounds = array<i64: 128, 128>}, {pipeline_mode = #tpu.pipeline_mode<synchronous>, transform_indices = @transform_4, window_bounds = array<i64: 1, 128>}, {transform_indices = @transform_5, window_bounds = array<i64: 1, 256, 128>}]} {
    %c0 = arith.constant 0 : index
    %c0_0 = arith.constant 0 : index
    %c0_1 = arith.constant 0 : index
    %c0_2 = arith.constant 0 : index
    %0 = vector.load %arg2[%c0, %c0_0, %c0_1, %c0_2] : memref<1x18x18x128xbf16, #tpu.memory_space<vmem>>, vector<1x18x18x128xbf16>
    %1 = vector.shape_cast %0 : vector<1x18x18x128xbf16> to vector<18x18x128xbf16>
    %2 = vector.extract_strided_slice %1 {offsets = [0, 0, 0], sizes = [16, 18, 128], strides = [1, 1, 1]} : vector<18x18x128xbf16> to vector<16x18x128xbf16>
    %3 = vector.extract_strided_slice %2 {offsets = [0, 0, 0], sizes = [16, 16, 128], strides = [1, 1, 1]} : vector<16x18x128xbf16> to vector<16x16x128xbf16>
    %4 = vector.extract_strided_slice %2 {offsets = [0, 1, 0], sizes = [16, 16, 128], strides = [1, 1, 1]} : vector<16x18x128xbf16> to vector<16x16x128xbf16>
    %5 = vector.extract_strided_slice %2 {offsets = [0, 2, 0], sizes = [16, 16, 128], strides = [1, 1, 1]} : vector<16x18x128xbf16> to vector<16x16x128xbf16>
    %6 = vector.extract_strided_slice %1 {offsets = [1, 0, 0], sizes = [16, 18, 128], strides = [1, 1, 1]} : vector<18x18x128xbf16> to vector<16x18x128xbf16>
    %7 = vector.extract_strided_slice %6 {offsets = [0, 0, 0], sizes = [16, 16, 128], strides = [1, 1, 1]} : vector<16x18x128xbf16> to vector<16x16x128xbf16>
    %8 = vector.extract_strided_slice %6 {offsets = [0, 1, 0], sizes = [16, 16, 128], strides = [1, 1, 1]} : vector<16x18x128xbf16> to vector<16x16x128xbf16>
    %9 = vector.extract_strided_slice %6 {offsets = [0, 2, 0], sizes = [16, 16, 128], strides = [1, 1, 1]} : vector<16x18x128xbf16> to vector<16x16x128xbf16>
    %10 = vector.extract_strided_slice %1 {offsets = [2, 0, 0], sizes = [16, 18, 128], strides = [1, 1, 1]} : vector<18x18x128xbf16> to vector<16x18x128xbf16>
    %11 = vector.extract_strided_slice %10 {offsets = [0, 0, 0], sizes = [16, 16, 128], strides = [1, 1, 1]} : vector<16x18x128xbf16> to vector<16x16x128xbf16>
    %12 = vector.extract_strided_slice %10 {offsets = [0, 1, 0], sizes = [16, 16, 128], strides = [1, 1, 1]} : vector<16x18x128xbf16> to vector<16x16x128xbf16>
    %13 = vector.extract_strided_slice %10 {offsets = [0, 2, 0], sizes = [16, 16, 128], strides = [1, 1, 1]} : vector<16x18x128xbf16> to vector<16x16x128xbf16>
    %14 = tpu.concatenate %3, %4, %5, %7, %8, %9, %11, %12, %13 in 2 : vector<16x16x128xbf16>, vector<16x16x128xbf16>, vector<16x16x128xbf16>, vector<16x16x128xbf16>, vector<16x16x128xbf16>, vector<16x16x128xbf16>, vector<16x16x128xbf16>, vector<16x16x128xbf16>, vector<16x16x128xbf16> -> vector<16x16x1152xbf16>
    %15 = vector.shape_cast %14 : vector<16x16x1152xbf16> to vector<256x1152xbf16>
    %c0_3 = arith.constant 0 : index
    %c0_4 = arith.constant 0 : index
    %16 = vector.load %arg3[%c0_3, %c0_4] : memref<1152x128xbf16, #tpu.memory_space<vmem>>, vector<1152x128xbf16>
    %cst = arith.constant dense<0.000000e+00> : vector<256x128xf32>
    %17 = tpu.matmul %15, %16, %cst {dimension_numbers = #tpu.dot_dimension_numbers<[1], [0], [0], [1], [0, 0, 1, 1], [], []>} : vector<256x1152xbf16>, vector<1152x128xbf16>, vector<256x128xf32> -> vector<256x128xf32>
    %c0_5 = arith.constant 0 : index
    %c0_6 = arith.constant 0 : index
    %18 = vector.load %arg4[%c0_5, %c0_6] : memref<1x128xf32, #tpu.memory_space<vmem>>, vector<1x128xf32>
    %19 = vector.broadcast %18 : vector<1x128xf32> to vector<256x128xf32>
    %20 = arith.addf %17, %19 : vector<256x128xf32>
    %cst_7 = arith.constant 0.000000e+00 : f32
    %21 = vector.broadcast %cst_7 : f32 to vector<256x128xf32>
    %22 = arith.maximumf %20, %21 : vector<256x128xf32>
    %23 = arith.truncf %22 : vector<256x128xf32> to vector<256x128xbf16>
    %c0_8 = arith.constant 0 : index
    %c0_9 = arith.constant 0 : index
    %24 = vector.load %arg5[%c0_8, %c0_9] : memref<128x128xbf16, #tpu.memory_space<vmem>>, vector<128x128xbf16>
    %cst_10 = arith.constant dense<0.000000e+00> : vector<256x128xf32>
    %25 = tpu.matmul %23, %24, %cst_10 {dimension_numbers = #tpu.dot_dimension_numbers<[1], [0], [0], [1], [0, 0, 1, 1], [], []>} : vector<256x128xbf16>, vector<128x128xbf16>, vector<256x128xf32> -> vector<256x128xf32>
    %c0_11 = arith.constant 0 : index
    %c0_12 = arith.constant 0 : index
    %26 = vector.load %arg6[%c0_11, %c0_12] : memref<1x128xf32, #tpu.memory_space<vmem>>, vector<1x128xf32>
    %27 = vector.broadcast %26 : vector<1x128xf32> to vector<256x128xf32>
    %28 = arith.addf %25, %27 : vector<256x128xf32>
    %29 = arith.truncf %28 : vector<256x128xf32> to vector<256x128xbf16>
    %c0_13 = arith.constant 0 : index
    %c0_14 = arith.constant 0 : index
    %c0_15 = arith.constant 0 : index
    %30 = vector.load %arg7[%c0_13, %c0_14, %c0_15] : memref<1x256x128xbf16, #tpu.memory_space<vmem>>, vector<1x256x128xbf16>
    %31 = vector.shape_cast %30 : vector<1x256x128xbf16> to vector<256x128xbf16>
    %32 = vector.shape_cast %29 : vector<256x128xbf16> to vector<1x256x128xbf16>
    tpu.vector_store %arg7[%c0_13, %c0_14, %c0_15], %32 {strides = array<i32>} : memref<1x256x128xbf16, #tpu.memory_space<vmem>>, vector<1x256x128xbf16>,
    return
  }
  func.func @transform_0(%arg0: i32, %arg1: i32) -> (i32, i32, i32, i32) {
    %c1_i32 = arith.constant 1 : i32
    %0 = arith.muli %arg0, %c1_i32 : i32
    %1 = arith.addi %0, %arg1 : i32
    %c0_i32 = arith.constant 0 : i32
    %c0_i32_0 = arith.constant 0 : i32
    %c0_i32_1 = arith.constant 0 : i32
    %c0_i32_2 = arith.constant 0 : i32
    return %1, %c0_i32, %c0_i32_0, %c0_i32_1 : i32, i32, i32, i32
  }
  func.func @transform_1(%arg0: i32, %arg1: i32) -> (i32, i32) {
    %c0_i32 = arith.constant 0 : i32
    %c0_i32_0 = arith.constant 0 : i32
    %c0_i32_1 = arith.constant 0 : i32
    return %c0_i32, %c0_i32_0 : i32, i32
  }
  func.func @transform_2(%arg0: i32, %arg1: i32) -> (i32, i32) {
    %c0_i32 = arith.constant 0 : i32
    %c0_i32_0 = arith.constant 0 : i32
    %c0_i32_1 = arith.constant 0 : i32
    return %c0_i32, %c0_i32_0 : i32, i32
  }
  func.func @transform_3(%arg0: i32, %arg1: i32) -> (i32, i32) {
    %c0_i32 = arith.constant 0 : i32
    %c0_i32_0 = arith.constant 0 : i32
    %c0_i32_1 = arith.constant 0 : i32
    return %c0_i32, %c0_i32_0 : i32, i32
  }
  func.func @transform_4(%arg0: i32, %arg1: i32) -> (i32, i32) {
    %c0_i32 = arith.constant 0 : i32
    %c0_i32_0 = arith.constant 0 : i32
    %c0_i32_1 = arith.constant 0 : i32
    return %c0_i32, %c0_i32_0 : i32, i32
  }
  func.func @transform_5(%arg0: i32, %arg1: i32) -> (i32, i32, i32) {
    %c0_i32 = arith.constant 0 : i32
    %c0_i32_0 = arith.constant 0 : i32
    return %arg0, %arg1, %c0_i32 : i32, i32, i32
  }
}

module attributes {stable_mosaic.version = 11 : i64} {
  func.func @_decode_kernel(%arg0: i32, %arg1: memref<4x2304xbf16, #tpu.memory_space<vmem>>, %arg2: memref<4x2304xf32, #tpu.memory_space<vmem>>, %arg3: memref<1x2304xbf16, #tpu.memory_space<vmem>>, %arg4: memref<4x2304xf32, #tpu.memory_space<vmem>>, %arg5: memref<1x2304xf32, #tpu.memory_space<vmem>>) attributes {dimension_semantics = [#tpu.dimension_semantics<parallel>], iteration_bounds = array<i64: 1>, scalar_prefetch = 0 : i64, scratch_operands = 0 : i64, tpu.core_type = #tpu.core_type<tc>, window_params = [{transform_indices = @transform_0, window_bounds = array<i64: 4, 2304>}, {transform_indices = @transform_1, window_bounds = array<i64: 4, 2304>}, {transform_indices = @transform_2, window_bounds = array<i64: 1, 2304>}, {transform_indices = @transform_3, window_bounds = array<i64: 4, 2304>}, {transform_indices = @transform_4, window_bounds = array<i64: 1, 2304>}]} {
    %c0 = arith.constant 0 : index
    %c0_0 = arith.constant 0 : index
    %0 = vector.load %arg2[%c0, %c0_0] : memref<4x2304xf32, #tpu.memory_space<vmem>>, vector<4x2304xf32>
    %c0_1 = arith.constant 0 : index
    %c0_2 = arith.constant 0 : index
    %1 = vector.load %arg1[%c0_1, %c0_2] : memref<4x2304xbf16, #tpu.memory_space<vmem>>, vector<4x2304xbf16>
    %2 = arith.extf %1 : vector<4x2304xbf16> to vector<4x2304xf32>
    %3 = vector.extract_strided_slice %0 {offsets = [0, 0], sizes = [1, 2304], strides = [1, 1]} : vector<4x2304xf32> to vector<1x2304xf32>
    %4 = vector.extract_strided_slice %0 {offsets = [1, 0], sizes = [1, 2304], strides = [1, 1]} : vector<4x2304xf32> to vector<1x2304xf32>
    %5 = vector.extract_strided_slice %0 {offsets = [2, 0], sizes = [1, 2304], strides = [1, 1]} : vector<4x2304xf32> to vector<1x2304xf32>
    %6 = vector.extract_strided_slice %0 {offsets = [3, 0], sizes = [1, 2304], strides = [1, 1]} : vector<4x2304xf32> to vector<1x2304xf32>
    %7 = vector.extract_strided_slice %2 {offsets = [0, 0], sizes = [1, 2304], strides = [1, 1]} : vector<4x2304xf32> to vector<1x2304xf32>
    %8 = vector.extract_strided_slice %2 {offsets = [1, 0], sizes = [1, 2304], strides = [1, 1]} : vector<4x2304xf32> to vector<1x2304xf32>
    %9 = vector.extract_strided_slice %2 {offsets = [2, 0], sizes = [1, 2304], strides = [1, 1]} : vector<4x2304xf32> to vector<1x2304xf32>
    %cst = arith.constant 4.13516665 : f32
    %10 = vector.broadcast %cst : f32 to vector<1x2304xf32>
    %11 = arith.minimumf %9, %10 : vector<1x2304xf32>
    %12 = vector.extract_strided_slice %2 {offsets = [3, 0], sizes = [1, 2304], strides = [1, 1]} : vector<4x2304xf32> to vector<1x2304xf32>
    %cst_3 = arith.constant 4.13516665 : f32
    %13 = vector.broadcast %cst_3 : f32 to vector<1x2304xf32>
    %14 = arith.minimumf %12, %13 : vector<1x2304xf32>
    %15 = arith.subf %5, %3 : vector<1x2304xf32>
    %16 = arith.subf %6, %4 : vector<1x2304xf32>
    %cst_4 = arith.constant 5.000000e-01 : f32
    %17 = vector.broadcast %cst_4 : f32 to vector<1x2304xf32>
    %18 = arith.mulf %17, %15 : vector<1x2304xf32>
    %19 = arith.addf %3, %18 : vector<1x2304xf32>
    %cst_5 = arith.constant 5.000000e-01 : f32
    %20 = vector.broadcast %cst_5 : f32 to vector<1x2304xf32>
    %21 = arith.mulf %20, %16 : vector<1x2304xf32>
    %22 = arith.addf %4, %21 : vector<1x2304xf32>
    %23 = arith.mulf %15, %7 : vector<1x2304xf32>
    %24 = arith.addf %23, %19 : vector<1x2304xf32>
    %25 = arith.mulf %16, %8 : vector<1x2304xf32>
    %26 = arith.addf %25, %22 : vector<1x2304xf32>
    %27 = math.exp %11 : vector<1x2304xf32>
    %28 = arith.mulf %27, %15 : vector<1x2304xf32>
    %29 = math.exp %14 : vector<1x2304xf32>
    %30 = arith.mulf %29, %16 : vector<1x2304xf32>
    %cst_6 = arith.constant 5.000000e-01 : f32
    %31 = vector.broadcast %cst_6 : f32 to vector<1x2304xf32>
    %32 = arith.mulf %31, %28 : vector<1x2304xf32>
    %33 = arith.subf %24, %32 : vector<1x2304xf32>
    %cst_7 = arith.constant 0.000000e+00 : f32
    %cst_8 = arith.constant 1.280000e+02 : f32
    %34 = vector.broadcast %cst_7 : f32 to vector<1x2304xf32>
    %35 = arith.maximumf %34, %33 : vector<1x2304xf32>
    %36 = vector.broadcast %cst_8 : f32 to vector<1x2304xf32>
    %37 = arith.minimumf %36, %35 : vector<1x2304xf32>
    %cst_9 = arith.constant 5.000000e-01 : f32
    %38 = vector.broadcast %cst_9 : f32 to vector<1x2304xf32>
    %39 = arith.mulf %38, %30 : vector<1x2304xf32>
    %40 = arith.subf %26, %39 : vector<1x2304xf32>
    %cst_10 = arith.constant 0.000000e+00 : f32
    %cst_11 = arith.constant 1.280000e+02 : f32
    %41 = vector.broadcast %cst_10 : f32 to vector<1x2304xf32>
    %42 = arith.maximumf %41, %40 : vector<1x2304xf32>
    %43 = vector.broadcast %cst_11 : f32 to vector<1x2304xf32>
    %44 = arith.minimumf %43, %42 : vector<1x2304xf32>
    %cst_12 = arith.constant 5.000000e-01 : f32
    %45 = vector.broadcast %cst_12 : f32 to vector<1x2304xf32>
    %46 = arith.mulf %45, %28 : vector<1x2304xf32>
    %47 = arith.addf %24, %46 : vector<1x2304xf32>
    %cst_13 = arith.constant 0.000000e+00 : f32
    %cst_14 = arith.constant 1.280000e+02 : f32
    %48 = vector.broadcast %cst_13 : f32 to vector<1x2304xf32>
    %49 = arith.maximumf %48, %47 : vector<1x2304xf32>
    %50 = vector.broadcast %cst_14 : f32 to vector<1x2304xf32>
    %51 = arith.minimumf %50, %49 : vector<1x2304xf32>
    %cst_15 = arith.constant 5.000000e-01 : f32
    %52 = vector.broadcast %cst_15 : f32 to vector<1x2304xf32>
    %53 = arith.mulf %52, %30 : vector<1x2304xf32>
    %54 = arith.addf %26, %53 : vector<1x2304xf32>
    %cst_16 = arith.constant 0.000000e+00 : f32
    %cst_17 = arith.constant 1.280000e+02 : f32
    %55 = vector.broadcast %cst_16 : f32 to vector<1x2304xf32>
    %56 = arith.maximumf %55, %54 : vector<1x2304xf32>
    %57 = vector.broadcast %cst_17 : f32 to vector<1x2304xf32>
    %58 = arith.minimumf %57, %56 : vector<1x2304xf32>
    %59 = tpu.concatenate %37, %44, %51, %58 in 0 : vector<1x2304xf32>, vector<1x2304xf32>, vector<1x2304xf32>, vector<1x2304xf32> -> vector<4x2304xf32>
    %c0_18 = arith.constant 0 : index
    %c0_19 = arith.constant 0 : index
    %60 = vector.load %arg4[%c0_18, %c0_19] : memref<4x2304xf32, #tpu.memory_space<vmem>>, vector<4x2304xf32>
    tpu.vector_store %arg4[%c0_18, %c0_19], %59 {strides = array<i32>} : memref<4x2304xf32, #tpu.memory_space<vmem>>, vector<4x2304xf32>,
    %c0_20 = arith.constant 0 : index
    %c0_21 = arith.constant 0 : index
    %61 = vector.load %arg3[%c0_20, %c0_21] : memref<1x2304xbf16, #tpu.memory_space<vmem>>, vector<1x2304xbf16>
    %62 = arith.extf %61 : vector<1x2304xbf16> to vector<1x2304xf32>
    %63 = arith.negf %62 : vector<1x2304xf32>
    %64 = math.exp %63 : vector<1x2304xf32>
    %cst_22 = arith.constant 1.000000e+00 : f32
    %65 = vector.broadcast %cst_22 : f32 to vector<1x2304xf32>
    %66 = arith.addf %65, %64 : vector<1x2304xf32>
    %67 = arith.divf %65, %66 : vector<1x2304xf32>
    %c0_23 = arith.constant 0 : index
    %c0_24 = arith.constant 0 : index
    %68 = vector.load %arg5[%c0_23, %c0_24] : memref<1x2304xf32, #tpu.memory_space<vmem>>, vector<1x2304xf32>
    tpu.vector_store %arg5[%c0_23, %c0_24], %67 {strides = array<i32>} : memref<1x2304xf32, #tpu.memory_space<vmem>>, vector<1x2304xf32>,
    return
  }
  func.func @transform_0(%arg0: i32) -> (i32, i32) {
    %c0_i32 = arith.constant 0 : i32
    %c0_i32_0 = arith.constant 0 : i32
    return %c0_i32, %arg0 : i32, i32
  }
  func.func @transform_1(%arg0: i32) -> (i32, i32) {
    %c0_i32 = arith.constant 0 : i32
    %c0_i32_0 = arith.constant 0 : i32
    return %c0_i32, %arg0 : i32, i32
  }
  func.func @transform_2(%arg0: i32) -> (i32, i32) {
    %c0_i32 = arith.constant 0 : i32
    %c0_i32_0 = arith.constant 0 : i32
    return %c0_i32, %arg0 : i32, i32
  }
  func.func @transform_3(%arg0: i32) -> (i32, i32) {
    %c0_i32 = arith.constant 0 : i32
    %c0_i32_0 = arith.constant 0 : i32
    return %c0_i32, %arg0 : i32, i32
  }
  func.func @transform_4(%arg0: i32) -> (i32, i32) {
    %c0_i32 = arith.constant 0 : i32
    %c0_i32_0 = arith.constant 0 : i32
    return %c0_i32, %arg0 : i32, i32
  }
}

</mosaic_0001>

<bundles_post_ra>
// kernel: neg.19
= control target key start
LH: loop header
LB: loop body
LE: loop exit
PB: predicated region body
PF: predicated region fallthrough
CT: control target
= control target key end

     0   :  { %s24_s0 = inlined_call_operand.vmem [shape: f32[1,9], index: 0, kind: input, shape index: {}]   ;;  %s25_s1 = inlined_call_operand.vmem [shape: f32[1,9], index: 1, kind: output, shape index: {}]  }
   0x1   :  { %v2_v0 = vld [vmem:[%s24_s0] sm:$0x1] }
   0x2   :  { %v5_v1 = vxor.u32 2147483648, %v2_v0 }
   0x4   :  { %7 = vst [vmem:[%s25_s1] sm:$0x1] %v5_v1 }

// kernel: _lambda_.2
= control target key start
LH: loop header
LB: loop body
LE: loop exit
PB: predicated region body
PF: predicated region fallthrough
CT: control target
= control target key end

     0   :  { %10 = vsyncpa [#allocation3], 0  ;;  %s3430_s18 = smov [#allocation2]   ;;  %s4250_s0 = inlined_call_operand.vmem [shape: bf16[1,18,18,128], index: 0, kind: input, shape index: {}]   ;;  %s4251_s1 = inlined_call_operand.hbm [shape: bf16[1152,128], index: 1, kind: input, shape index: {}]   ;;  %s4252_s2 = inlined_call_operand.vmem [shape: f32[1,128], index: 2, kind: input, shape index: {}, may-alias: {2,4}]   ;;  %s4253_s3 = inlined_call_operand.vmem [shape: bf16[128,128], index: 3, kind: input, shape index: {}]   ;;  %s4254_s4 = inlined_call_operand.vmem [shape: f32[1,128], index: 4, kind: input, shape index: {}, may-alias: {2,4}]   ;;  %s4255_s5 = inlined_call_operand.vmem [shape: bf16[1,256,128], index: 5, kind: output, shape index: {}]  }
   0x1   :  { %s25_s19 = sshll.u32 %s3430_s18, 4  ;;  %s3406_s22 = scalar_lea.hbm %s4251_s1, 9216  ;;  %s26_s19 = int_to_ptr.vmem [resolvable:$true] %s25_s19 }
   0x2   :  { %p3407_p0 = scmp.ne.s32.totalorder %s4251_s1, %s3406_s22  ;;  %p3410_p1 = scmp.lt.u32.totalorder %s3406_s22, %s4251_s1 }
   0x4   :  { %p3412_p2 = pnand %p3410_p1, %p3407_p0 }
   0x6   :  { %3415 = shalt.err (!%p3412_p2)
}
   0x7   :  { %s3416_s27 = scalar_lea.vmem %s26_s19, 9216  ;;  %p3421_p4 = scmp.lt.s32.totalorder %s26_s19, %s26_s19 }
   0x8   :  { %p3417_p3 = scmp.ne.s32.totalorder %s26_s19, %s3416_s27  ;;  %p3422_p5 = scmp.lt.s32.totalorder %s3416_s27, %s3416_s27 }
   0xa   :  { %p3423_p6 = por %p3422_p5, %p3421_p4 }
   0xc   :  { %p3424_p7 = pnand %p3423_p6, %p3417_p3 }
   0xe   :  { %3427 = shalt.err (!%p3424_p7)
}
   0xf   :  { %s3431_s28 = smov 64   ;;  %s3432_s29 = smov 4  }
  0x10   :  { %31 = dma.hbm_to_vmem [thread:$0]  %s4251_s1, 9216, %s26_s19, [#allocation3], %s3431_s28, %s3431_s28, %s3432_s29  }
  0x11   :  { %3428 = dma.done.wait [#allocation3], 9216  }
  0x12   :  { %3429 = vsyncadd [#allocation3], 4294958080  ;;  %v3290_v0 = vld [vmem:[#allocation2 + $0x40] sm:$0xff]   ;;  %v3294_v4 = vld [vmem:[#allocation2 + $0x48] sm:$0xff]   ;;  %vm253_vm0 = vsmask.f32 7424 }
  0x13   :  { %v3291_v1 = vld [vmem:[#allocation2] sm:$0xff]   ;;  %2695 = vmatprep.subr.bf16.mxu0 %v3290_v0  ;;  %v3295_v5 = vld [vmem:[#allocation2 + $0x8] sm:$0xff]   ;;  %v3298_v8 = vld [vmem:[#allocation2 + $0x50] sm:$0xff]   ;;  %vm462_vm1 = vcmask 1046528  }
  0x14   :  { %v3292_v2 = vld [vmem:[#allocation2 + $0xc0] sm:$0xff]   ;;  %2696 = vmatpush3.bf16.msra.mxu0 %v3291_v1  ;;  %v3296_v6 = vld [vmem:[#allocation2 + $0xc8] sm:$0xff]   ;;  %v3299_v9 = vld [vmem:[#allocation2 + $0x10] sm:$0xff]  }
  0x15   :  { %v3293_v3 = vld [vmem:[#allocation2 + $0x80] sm:$0xff]   ;;  %2807 = vmatprep.subr.bf16.mxu1 %v3292_v2  ;;  %2697 = vmatprep.subr.bf16.mxu0 %v3294_v4  ;;  %v3297_v7 = vld [vmem:[#allocation2 + $0x88] sm:$0xff]   ;;  %v3300_v10 = vld [vmem:[#allocation2 + $0xd0] sm:$0xff]  }
  0x16   :  { %2808 = vmatpush3.bf16.msra.mxu1 %v3293_v3  ;;  %v3301_v11 = vld [vmem:[#allocation2 + $0x90] sm:$0xff]   ;;  %v3302_v12 = vld [vmem:[#allocation2 + $0x58] sm:$0xff]   ;;  %v3306_v16 = vld [vmem:[#allocation2 + $0x60] sm:$0xff]  }
  0x17   :  { %2809 = vmatprep.subr.bf16.mxu1 %v3296_v6  ;;  %v3303_v13 = vld [vmem:[#allocation2 + $0x18] sm:$0xff]   ;;  %v3307_v17 = vld [vmem:[#allocation2 + $0x20] sm:$0xff]   ;;  %v3310_v20 = vld [vmem:[#allocation2 + $0x68] sm:$0xff]  }
  0x18   :  { %2698 = vmatpush3.bf16.msra.mxu0 %v3295_v5  ;;  %v3304_v14 = vld [vmem:[#allocation2 + $0xd8] sm:$0xff]   ;;  %v3308_v18 = vld [vmem:[#allocation2 + $0xe0] sm:$0xff]   ;;  %v3311_v21 = vld [vmem:[#allocation2 + $0x28] sm:$0xff]  }
  0x19   :  { %2699 = vmatprep.subr.bf16.mxu0 %v3298_v8  ;;  %v3305_v15 = vld [vmem:[#allocation2 + $0x98] sm:$0xff]   ;;  %v3309_v19 = vld [vmem:[#allocation2 + $0xa0] sm:$0xff]   ;;  %v3312_v22 = vld [vmem:[#allocation2 + $0xe8] sm:$0xff]  }
  0x1a   :  { %2810 = vmatpush3.bf16.msra.mxu1 %v3297_v7  ;;  %v3313_v23 = vld [vmem:[#allocation2 + $0xa8] sm:$0xff]   ;;  %v3314_v24 = vld [vmem:[#allocation2 + $0x70] sm:$0xff]   ;;  %v3318_v28 = vld [vmem:[#allocation2 + $0x78] sm:$0xff]  }
  0x1b   :  { %2811 = vmatprep.subr.bf16.mxu1 %v3300_v10  ;;  %v3315_v25 = vld [vmem:[#allocation2 + $0x30] sm:$0xff]   ;;  %v3319_v29 = vld [vmem:[#allocation2 + $0x38] sm:$0xff]   ;;  %v3321_v31 = vld [vmem:[%s4250_s0] sm:$0xff]  }
  0x1c   :  { %2700 = vmatpush3.bf16.msra.mxu0 %v3299_v9  ;;  %v3316_v26 = vld [vmem:[#allocation2 + $0xf0] sm:$0xff]   ;;  %v3320_v30 = vld [vmem:[#allocation2 + $0xf8] sm:$0xff]   ;;  %v3322_v32 = vld [vmem:[%s4250_s0 + $0x8] ss:$0 sps:$4 sm:$0x11]   ;;  %v255_v34 = vshrl.u32 %v3321_v31, 16 }
  0x1d   :  { %2701 = vmatprep.subr.bf16.mxu0 %v3302_v12  ;;  %v3317_v27 = vld [vmem:[#allocation2 + $0xb0] sm:$0xff]   ;;  %v3323_v33 = vld [vmem:[#allocation2 + $0xb8] sm:$0xff]   ;;  %v257_v35 = vshll.u32 %v3321_v31, 16  ;;  %v262_v36 = vshll.u32 %v3322_v32, 16  ;;  %v3324_v37 = vld [vmem:[#allocation2 + $0x140] sm:$0xff]   ;;  %v463_v39 = vrot.slane %v3321_v31, 1 }
  0x1e   :  { %2812 = vmatpush3.bf16.msra.mxu1 %v3301_v11  ;;  %v3325_v38 = vld [vmem:[%s4250_s0 + $0xc] sm:$0xff]   ;;  %v3326_v42 = vld [vmem:[#allocation2 + $0x100] sm:$0xff]   ;;  %v464_v43 = vrot.slane %v3322_v32, 1  ;;  %v3327_v47 = vld [vmem:[%s4250_s0 + $0x14] ss:$0 sps:$4 sm:$0x11]  }
  0x1f   :  { %2813 = vmatprep.subr.bf16.mxu1 %v3304_v14  ;;  %v259_v40 = vrot.slane %v257_v35, 1  ;;  %v264_v41 = vrot.slane %v262_v36, 1  ;;  %1355 = vmatprep.mubr.bf16.mxu1 %v3325_v38  ;;  %v267_v44 = vshrl.u32 %v3325_v38, 16  ;;  %v269_v45 = vshll.u32 %v3325_v38, 16  ;;  %v3490_v48 = vld [vmem:[%s4250_s0 + $0x18] sm:$0xff]   ;;  %v3330_v59 = vld [vmem:[#allocation2 + $0x148] sm:$0xff]  }
  0x20   :  { %2702 = vmatpush3.bf16.msra.mxu0 %v3303_v13  ;;  %v465_v49 = vsel %vm462_vm1, %v463_v39, %v464_v43  ;;  %v466_v51 = vrot.slane %v3325_v38, 1  ;;  %v274_v53 = vshll.u32 %v3327_v47, 16  ;;  %v467_v54 = vrot.slane %v3327_v47, 1  ;;  %v3329_v55 = vld [vmem:[%s4250_s0 + $0x20] ss:$0 sps:$4 sm:$0x11]  }
  0x21   :  { %2703 = vmatprep.subr.bf16.mxu0 %v3306_v16  ;;  %v260_v46 = vor.u32 %v259_v40, %v255_v34  ;;  %v271_v50 = vrot.slane %v269_v45, 1  ;;  %v279_v56 = vshrl.u32 %v3490_v48, 16  ;;  %v281_v58 = vshll.u32 %v3490_v48, 16  ;;  %v3503_v63 = vld [vmem:[%s4250_s0 + $0x24] sm:$0xff]   ;;  %v3336_v7 = vld [vmem:[#allocation2 + $0x150] sm:$0xff]  }
  0x22   :  { %2814 = vmatpush3.bf16.msra.mxu1 %v3305_v15  ;;  %v276_v60 = vrot.slane %v274_v53, 1  ;;  %v286_v61 = vshll.u32 %v3329_v55, 16  ;;  %v3332_v2 = vld [vmem:[#allocation2 + $0x108] sm:$0xff]   ;;  %v3510_v3 = vsel %vm462_vm1, %v466_v51, %v467_v54  ;;  %v293_v6 = vshll.u32 %v3503_v63, 16  ;;  %v3524_v12 = vld [vmem:[%s4250_s0 + $0x30] sm:$0xff]   ;;  %v3347_v35 = vld [vmem:[#allocation2 + $0x1c0] sm:$0xff]  }
  0x23   :  { %2815 = vmatprep.subr.bf16.mxu1 %v3308_v18  ;;  %v265_v52 = vsel %vm253_vm0, %v260_v46, %v264_v41  ;;  %v272_v57 = vor.u32 %v271_v50, %v267_v44  ;;  %v283_v62 = vrot.slane %v281_v58, 1  ;;  %v3333_v5 = vld [vmem:[%s4250_s0 + $0x2c] ss:$0 sps:$4 sm:$0x11]   ;;  %v291_v9 = vshrl.u32 %v3503_v63, 16  ;;  %v3338_v13 = vld [vmem:[#allocation2 + $0x110] sm:$0xff]  }
  0x24   :  { %2704 = vmatpush3.bf16.msra.mxu0 %v3307_v17  ;;  %1194 = vmatprep.mubr.bf16.mxu0 %v265_v52  ;;  %v288_v1 = vrot.slane %v286_v61, 1  ;;  %v295_v10 = vrot.slane %v293_v6, 1  ;;  %v298_v11 = vshll.u32 %v3333_v5, 16  ;;  %v469_v14 = vrot.slane %v3490_v48, 1  ;;  %v3560_v36 = vld [vmem:[%s4250_s0 + $0x48] sm:$0xff]   ;;  %v3352_v46 = vld [vmem:[#allocation2 + $0x120] sm:$0xff]  }
  0x25   :  { %2705 = vmatprep.subr.bf16.mxu0 %v3310_v20  ;;  %v3506_v0 = vsel %vm253_vm0, %v272_v57, %v276_v60  ;;  %v284_v4 = vor.u32 %v283_v62, %v279_v56  ;;  %v470_v15 = vrot.slane %v3329_v55, 1  ;;  %v3335_v16 = vld [vmem:[%s4250_s0 + $0x38] ss:$0 sps:$4 sm:$0x11]   ;;  %v475_v43 = vrot.slane %v3524_v12, 1  ;;  %v3355_v56 = vld [vmem:[#allocation2 + $0x1c8] sm:$0xff]  }
  0x26   :  { %2816 = vmatpush3.bf16.msra.mxu1 %v3309_v19  ;;  %v296_v17 = vor.u32 %v295_v10, %v291_v9  ;;  %v300_v18 = vrot.slane %v298_v11, 1  ;;  %v305_v19 = vshll.u32 %v3524_v12, 16  ;;  %v3339_v32 = vld [vmem:[%s4250_s0 + $0x44] ss:$0 sps:$4 sm:$0x11]   ;;  %v476_v44 = vrot.slane %v3335_v16, 1 }
  0x27   :  { %2817 = vmatprep.subr.bf16.mxu1 %v3312_v22  ;;  %v3518_v8 = vsel %vm253_vm0, %v284_v4, %v288_v1  ;;  %v3534_v20 = vsel %vm462_vm1, %v469_v14, %v470_v15  ;;  %v303_v22 = vshrl.u32 %v3524_v12, 16  ;;  %v322_v41 = vshll.u32 %v3339_v32, 16  ;;  %v3341_v45 = vld [vmem:[%s4250_s0 + $0x50] ss:$0 sps:$4 sm:$0x11]   ;;  %v3582_v53 = vld [vmem:[%s4250_s0 + $0x54] sm:$0xff]  }
  0x28   :  { %2706 = vmatpush3.bf16.msra.mxu0 %v3311_v21  ;;  %v3342_v21 = vld [vmem:[#allocation2 + $0x158] sm:$0xff]   ;;  %v329_v47 = vshll.u32 %v3560_v36, 16  ;;  %v3576_v51 = vsel %vm462_vm1, %v475_v43, %v476_v44  ;;  %v327_v52 = vshrl.u32 %v3560_v36, 16  ;;  %v334_v55 = vshll.u32 %v3341_v45, 16  ;;  %v3356_v57 = vld [vmem:[#allocation2 + $0x188] sm:$0xff]   ;;  %v3363_v11 = vld [vmem:[#allocation2 + $0x1d0] sm:$0xff]  }
  0x29   :  { %2707 = vmatprep.subr.bf16.mxu0 %v3314_v24  ;;  %v3544_v24 = vsel %vm253_vm0, %v296_v17, %v300_v18  ;;  %v324_v50 = vrot.slane %v322_v41, 1  ;;  %v479_v60 = vrot.slane %v3339_v32, 1  ;;  %v3345_v61 = vld [vmem:[%s4250_s0 + $0x5c] ss:$0 sps:$4 sm:$0x11]   ;;  %v3358_v62 = vld [vmem:[#allocation2 + $0x168] sm:$0xff]  }
  0x2a   :  { %2818 = vmatpush3.bf16.msra.mxu1 %v3313_v23  ;;  %v3540_v23 = vld [vmem:[%s4250_s0 + $0x3c] sm:$0xff]   ;;  %v331_v54 = vrot.slane %v329_v47, 1  ;;  %v341_v4 = vshll.u32 %v3582_v53, 16  ;;  %v3360_v6 = vld [vmem:[#allocation2 + $0x128] sm:$0xff]   ;;  %v482_v9 = vrot.slane %v3341_v45, 1  ;;  %v346_v10 = vshll.u32 %v3345_v61, 16 }
  0x2b   :  { %2819 = vmatprep.subr.bf16.mxu1 %v3316_v26  ;;  %v310_v26 = vshll.u32 %v3335_v16, 16  ;;  %v315_v39 = vshrl.u32 %v3540_v23, 16  ;;  %v339_v14 = vshrl.u32 %v3582_v53, 16  ;;  %v3608_v16 = vld [vmem:[%s4250_s0 + $0x60] sm:$0xff]   ;;  %v3364_v17 = vld [vmem:[#allocation2 + $0x190] sm:$0xff]   ;;  %v3374_v44 = vld [vmem:[#allocation2 + $0x178] sm:$0xff]  }
  0x2c   :  { %2708 = vmatpush3.bf16.msra.mxu0 %v3315_v25  ;;  %v307_v25 = vrot.slane %v305_v19, 1  ;;  %v332_v1 = vor.u32 %v331_v54, %v327_v52  ;;  %v343_v15 = vrot.slane %v341_v4, 1  ;;  %v3349_v18 = vld [vmem:[%s4250_s0 + $0x68] ss:$0 sps:$4 sm:$0x11]   ;;  %v3366_v19 = vld [vmem:[#allocation2 + $0x170] sm:$0xff]  }
  0x2d   :  { %2709 = vmatprep.subr.bf16.mxu0 %v3318_v28  ;;  %v473_v28 = vrot.slane %v3333_v5, 1  ;;  %v358_v32 = vshll.u32 %v3349_v18, 16  ;;  %v3376_v52 = vld [vmem:[#allocation2 + $0x138] sm:$0xff]  }
  0x2e   :  { %2820 = vmatpush3.bf16.msra.mxu1 %v3317_v27  ;;  %v472_v27 = vrot.slane %v3503_v63, 1 }
  0x2f   :  { %2821 = vmatprep.subr.bf16.mxu1 %v3320_v30  ;;  %v308_v30 = vor.u32 %v307_v25, %v303_v22  ;;  %v344_v22 = vor.u32 %v343_v15, %v339_v14  ;;  %v353_v25 = vshll.u32 %v3608_v16, 16  ;;  %v360_v43 = vrot.slane %v358_v32, 1  ;;  %v3383_v15 = vld [vmem:[#allocation2 + $0x1f0] sm:$0xff]  }
  0x30   :  { %2710 = vmatpush3.bf16.msra.mxu0 %v3319_v29  ;;  %v3344_v29 = vld [vmem:[#allocation2 + $0x118] sm:$0xff]   ;;  %v3555_v34 = vsel %vm462_vm1, %v472_v27, %v473_v28  ;;  %v351_v28 = vshrl.u32 %v3608_v16, 16 }
  0x31   :  { %2919 = vmatprep.subr.bf16.mxu0 %v3324_v37  ;;  %v3348_v37 = vld [vmem:[#allocation2 + $0x180] sm:$0xff]  }
  0x32   :  { %2822 = vmatpush3.bf16.msra.mxu1 %v3323_v33  ;;  %v317_v33 = vshll.u32 %v3540_v23, 16 }
  0x33   :  { %1195 = vmatmul.mubr.bf16.vlgmr.msra.gmra.mrb[0].mxu0 %v3321_v31  ;;  %v312_v31 = vrot.slane %v310_v26, 1  ;;  %3031 = vmatprep.subr.bf16.mxu1 %v3347_v35  ;;  %v3368_v26 = vld [vmem:[#allocation2 + $0x130] sm:$0xff]   ;;  %v485_v35 = vrot.slane %v3345_v61, 1  ;;  %v3379_v61 = vld [vmem:[#allocation2 + $0x1e8] sm:$0xff]  }
  0x34   :  { %2920 = vmatpush3.bf16.msra.mxu0 %v3326_v42  ;;  %1202 = vmatprep.mubr.bf16.mxu0 %v3506_v0  ;;  %v319_v40 = vrot.slane %v317_v33, 1  ;;  %v3350_v42 = vld [vmem:[#allocation2 + $0x160] sm:$0xff]   ;;  %v484_v33 = vrot.slane %v3582_v53, 1 }
  0x35   :  { %1356 = vmatmul.mubr.bf16.vlgmr.msra.gmra.mrb[0].mxu1 %v465_v49  ;;  %2921 = vmatprep.subr.bf16.mxu0 %v3330_v59  ;;  %v478_v59 = vrot.slane %v3540_v23, 1 }
  0x36   :  { %1363 = vmatprep.mubr.bf16.mxu1 %v3490_v48  ;;  %3032 = vmatpush3.bf16.msra.mxu1 %v3348_v37  ;;  %v320_v49 = vor.u32 %v319_v40, %v315_v39  ;;  %v3371_v37 = vld [vmem:[#allocation2 + $0x1d8] sm:$0xff]   ;;  %v3637_v40 = vld [vmem:[%s4250_s0 + $0x74] ss:$0 sps:$4 sm:$0x11]   ;;  %v3641_v45 = vsel %vm462_vm1, %v484_v33, %v485_v35 }
  0x37   :  { %3033 = vmatprep.subr.bf16.mxu1 %v3355_v56  ;;  %v3597_v5 = vsel %vm462_vm1, %v478_v59, %v479_v60  ;;  %v3372_v39 = vld [vmem:[#allocation2 + $0x198] sm:$0xff]   ;;  %v3377_v56 = vld [vmem:[#allocation2 + $0x1e0] sm:$0xff]  }
  0x38   :  { %2922 = vmatpush3.bf16.msra.mxu0 %v3332_v2  ;;  %v3586_v58 = vsel %vm253_vm0, %v320_v49, %v324_v50  ;;  %v336_v2 = vrot.slane %v334_v55, 1  ;;  %v3648_v49 = vld [vmem:[%s4250_s0 + $0x78] sm:$0xff]   ;;  %v370_v55 = vshll.u32 %v3637_v40, 16  ;;  %v3378_v59 = vld [vmem:[#allocation2 + $0x1a0] sm:$0xff]  }
  0x39   :  { %2923 = vmatprep.subr.bf16.mxu0 %v3336_v7  ;;  %v481_v7 = vrot.slane %v3560_v36, 1  ;;  %v3357_v60 = vld [vmem:[%s4250_s0 + $0x80] ss:$0 sps:$4 sm:$0x11]   ;;  %v375_v14 = vshrl.u32 %v3648_v49, 16  ;;  %v493_v32 = vrot.slane %v3648_v49, 1 }
  0x3a   :  { %3034 = vmatpush3.bf16.msra.mxu1 %v3356_v57  ;;  %v488_v57 = vrot.slane %v3349_v18, 1  ;;  %v372_v4 = vrot.slane %v370_v55, 1  ;;  %v3384_v18 = vld [vmem:[#allocation2 + $0x1b0] sm:$0xff]   ;;  %v3386_v33 = vld [vmem:[#allocation2 + $0x1b8] sm:$0xff]  }
  0x3b   :  { %1203 = vmatmul.mubr.bf16.gmra.mrb[4].mxu0 %v3325_v38  ;;  %v3564_v38 = vsel %vm253_vm0, %v308_v30, %v312_v31  ;;  %3035 = vmatprep.subr.bf16.mxu1 %v3363_v11  ;;  %v3618_v27 = vsel %vm462_vm1, %v481_v7, %v482_v9  ;;  %v355_v31 = vrot.slane %v353_v25, 1  ;;  %v3361_v7 = vld [vmem:[%s4250_s0 + $0x8c] ss:$0 sps:$4 sm:$0x11]   ;;  %v3673_v11 = vld [vmem:[%s4250_s0 + $0x84] sm:$0xff]  }
  0x3c   :  { %1210 = vmatprep.mubr.bf16.mxu0 %v3518_v8  ;;  %2924 = vmatpush3.bf16.msra.mxu0 %v3338_v13  ;;  %v3602_v13 = vsel %vm253_vm0, %v332_v1, %v336_v2  ;;  %v3381_v1 = vld [vmem:[#allocation2 + $0x1a8] sm:$0xff]   ;;  %v389_v25 = vshll.u32 %v3673_v11, 16 }
  0x3d   :  { %1364 = vmatmul.mubr.bf16.gmra.mrb[4].mxu1 %v3510_v3  ;;  %2925 = vmatprep.subr.bf16.mxu0 %v3342_v21  ;;  %v348_v21 = vrot.slane %v346_v10, 1  ;;  %v491_v10 = vrot.slane %v3637_v40, 1 }
  0x3e   :  { %1371 = vmatprep.mubr.bf16.mxu1 %v3503_v63  ;;  %3036 = vmatpush3.bf16.msra.mxu1 %v3364_v17 }
  0x3f   :  { %v3628_v30 = vsel %vm253_vm0, %v344_v22, %v348_v21  ;;  %3037 = vmatprep.subr.bf16.mxu1 %v3371_v37  ;;  %v382_v21 = vshll.u32 %v3357_v60, 16  ;;  %v3385_v22 = vld [vmem:[#allocation2 + $0x1f8] sm:$0xff]  }
  0x40   :  { %2926 = vmatpush3.bf16.msra.mxu0 %v3344_v29  ;;  %v3624_v29 = vld [vmem:[%s4250_s0 + $0x6c] sm:$0xff]  }
  0x41   :  { %2927 = vmatprep.subr.bf16.mxu0 %v3350_v42  ;;  %v365_v41 = vshll.u32 %v3624_v29, 16  ;;  %v356_v42 = vor.u32 %v355_v31, %v351_v28  ;;  %v363_v47 = vshrl.u32 %v3624_v29, 16  ;;  %v394_v28 = vshll.u32 %v3361_v7, 16  ;;  %v3688_v31 = vld [vmem:[#allocation2 + $0x200] sm:$0xff]  }
  0x42   :  { %3038 = vmatpush3.bf16.msra.mxu1 %v3372_v39  ;;  %v384_v37 = vrot.slane %v382_v21, 1  ;;  %v494_v39 = vrot.slane %v3357_v60, 1  ;;  %v3719_v60 = vld [vmem:[%s4250_s0 + $0x9c] sm:$0xff]  }
  0x43   :  { %1211 = vmatmul.mubr.bf16.gmra.mrb[8].mxu0 %v3490_v48  ;;  %v367_v50 = vrot.slane %v365_v41, 1  ;;  %v3652_v54 = vsel %vm253_vm0, %v356_v42, %v360_v43  ;;  %3039 = vmatprep.subr.bf16.mxu1 %v3377_v56  ;;  %v387_v41 = vshrl.u32 %v3673_v11, 16  ;;  %v391_v42 = vrot.slane %v389_v25, 1 }
  0x44   :  { %1218 = vmatprep.mubr.bf16.mxu0 %v3544_v24  ;;  %2928 = vmatpush3.bf16.msra.mxu0 %v3352_v46  ;;  %v487_v46 = vrot.slane %v3608_v16, 1  ;;  %v396_v43 = vrot.slane %v394_v28, 1 }
  0x45   :  { %1372 = vmatmul.mubr.bf16.gmra.mrb[8].mxu1 %v3534_v20  ;;  %2929 = vmatprep.subr.bf16.mxu0 %v3358_v62  ;;  %v377_v62 = vshll.u32 %v3648_v49, 16  ;;  %v368_v2 = vor.u32 %v367_v50, %v363_v47  ;;  %v3365_v47 = vld [vmem:[%s4250_s0 + $0x98] ss:$0 sps:$4 sm:$0x11]   ;;  %v392_v50 = vor.u32 %v391_v42, %v387_v41 }
  0x46   :  { %1379 = vmatprep.mubr.bf16.mxu1 %v3524_v12  ;;  %3040 = vmatpush3.bf16.msra.mxu1 %v3378_v59  ;;  %v3667_v9 = vsel %vm462_vm1, %v487_v46, %v488_v57  ;;  %v406_v59 = vshll.u32 %v3365_v47, 16 }
  0x47   :  { %3041 = vmatprep.subr.bf16.mxu1 %v3379_v61  ;;  %v379_v17 = vrot.slane %v377_v62, 1  ;;  %v3713_v55 = vsel %vm253_vm0, %v392_v50, %v396_v43  ;;  %v496_v61 = vrot.slane %v3673_v11, 1  ;;  %v497_v62 = vrot.slane %v3361_v7, 1  ;;  %v3761_v43 = vld [vmem:[%s4250_s0 + $0xb4] sm:$0xff]  }
  0x48   :  { %2930 = vmatpush3.bf16.msra.mxu0 %v3360_v6  ;;  %v490_v6 = vrot.slane %v3624_v29, 1  ;;  %v411_v7 = vshrl.u32 %v3719_v60, 16 }
  0x49   :  { %2931 = vmatprep.subr.bf16.mxu0 %v3366_v19  ;;  %v3678_v19 = vsel %vm253_vm0, %v368_v2, %v372_v4  ;;  %v380_v35 = vor.u32 %v379_v17, %v375_v14  ;;  %v408_v2 = vrot.slane %v406_v59, 1  ;;  %v3369_v4 = vld [vmem:[%s4250_s0 + $0xa4] ss:$0 sps:$4 sm:$0x11]   ;;  %v437_v59 = vshll.u32 %v3761_v43, 16 }
  0x4a   :  { %3042 = vmatpush3.bf16.msra.mxu1 %v3381_v1  ;;  %v3694_v40 = vsel %vm462_vm1, %v490_v6, %v491_v10  ;;  %v413_v6 = vshll.u32 %v3719_v60, 16  ;;  %v3730_v10 = vsel %vm462_vm1, %v496_v61, %v497_v62  ;;  %v418_v17 = vshll.u32 %v3369_v4, 16 }
  0x4b   :  { %1219 = vmatmul.mubr.bf16.gmra.mrb[12].mxu0 %v3503_v63  ;;  %3043 = vmatprep.subr.bf16.mxu1 %v3383_v15  ;;  %v3700_v46 = vsel %vm253_vm0, %v380_v35, %v384_v37 }
  0x4c   :  { %1226 = vmatprep.mubr.bf16.mxu0 %v3564_v38  ;;  %2932 = vmatpush3.bf16.msra.mxu0 %v3368_v26  ;;  %v3685_v26 = vld [vmem:[%s4250_s0 + $0x90] sm:$0xff]   ;;  %v415_v15 = vrot.slane %v413_v6, 1  ;;  %v420_v28 = vrot.slane %v418_v17, 1 }
  0x4d   :  { %1380 = vmatmul.mubr.bf16.gmra.mrb[12].mxu1 %v3555_v34  ;;  %2933 = vmatprep.subr.bf16.mxu0 %v3374_v44  ;;  %v401_v44 = vshll.u32 %v3685_v26, 16  ;;  %v399_v56 = vshrl.u32 %v3685_v26, 16  ;;  %v499_v21 = vrot.slane %v3685_v26, 1 }
  0x4e   :  { %1387 = vmatprep.mubr.bf16.mxu1 %v3540_v23  ;;  %3044 = vmatpush3.bf16.msra.mxu1 %v3384_v18  ;;  %v3740_v18 = vld [vmem:[%s4250_s0 + $0xa8] sm:$0xff]   ;;  %v416_v25 = vor.u32 %v415_v15, %v411_v7 }
  0x4f   :  { %3045 = vmatprep.subr.bf16.mxu1 %v3385_v22  ;;  %v403_v57 = vrot.slane %v401_v44, 1  ;;  %v500_v22 = vrot.slane %v3365_v47, 1  ;;  %v502_v44 = vrot.slane %v3719_v60, 1  ;;  %v503_v47 = vrot.slane %v3369_v4, 1 }
  0x50   :  { %2934 = vmatpush3.bf16.msra.mxu0 %v3376_v52  ;;  %v3709_v52 = vsel %vm462_vm1, %v493_v32, %v494_v39  ;;  %v3373_v32 = vld [vmem:[%s4250_s0 + $0xb0] ss:$0 sps:$4 sm:$0x11]   ;;  %v3755_v37 = vsel %vm253_vm0, %v416_v25, %v420_v28  ;;  %v423_v39 = vshrl.u32 %v3740_v18, 16  ;;  %v505_v6 = vrot.slane %v3740_v18, 1 }
  0x51   :  { %3191 = vmatprep.subr.bf16.mxu0 %v3688_v31  ;;  %v404_v1 = vor.u32 %v403_v57, %v399_v56  ;;  %v3751_v35 = vsel %vm462_vm1, %v499_v21, %v500_v22  ;;  %v430_v42 = vshll.u32 %v3373_v32, 16  ;;  %v3380_v57 = vld [vmem:[%s4250_s0 + $0xbc] ss:$0 sps:$4 sm:$0x11]   ;;  %v3772_v61 = vsel %vm462_vm1, %v502_v44, %v503_v47  ;;  %v3789_v22 = vld [vmem:[%s4250_s0 + $0xc0] sm:$0xff]  }
  0x52   :  { %3046 = vmatpush3.bf16.msra.mxu1 %v3386_v33  ;;  %v425_v33 = vshll.u32 %v3740_v18, 16  ;;  %v442_v4 = vshll.u32 %v3380_v57, 16  ;;  %v506_v7 = vrot.slane %v3373_v32, 1  ;;  %v508_v28 = vrot.slane %v3761_v43, 1 }
  0x53   :  { %1227 = vmatmul.mubr.bf16.gmra.mrb[16].mxu0 %v3524_v12  ;;  %v3734_v14 = vsel %vm253_vm0, %v404_v1, %v408_v2  ;;  %v432_v56 = vrot.slane %v430_v42, 1  ;;  %v435_v1 = vshrl.u32 %v3761_v43, 16  ;;  %v439_v2 = vrot.slane %v437_v59, 1  ;;  %v3390_v42 = vld [vmem:[#allocation2 + $0x218] sm:$0xff]  }
  0x54   :  { %1234 = vmatprep.mubr.bf16.mxu0 %v3586_v58  ;;  %v427_v41 = vrot.slane %v425_v33, 1  ;;  %v444_v17 = vrot.slane %v442_v4, 1  ;;  %v3784_v21 = vsel %vm462_vm1, %v505_v6, %v506_v7  ;;  %v509_v32 = vrot.slane %v3380_v57, 1 }
  0x55   :  { %1388 = vmatmul.mubr.bf16.gmra.mrb[16].mxu1 %v3576_v51  ;;  %v440_v15 = vor.u32 %v439_v2, %v435_v1  ;;  %v537_v57 = vshrl.u32 %v3789_v22, 16  ;;  %v3877_v2 = vld [vmem:[%s4250_s0 + $0xcc] sm:$0xff]  }
  0x56   :  { %1395 = vmatprep.mubr.bf16.mxu1 %v3560_v36  ;;  %v428_v50 = vor.u32 %v427_v41, %v423_v39  ;;  %v3800_v33 = vsel %vm462_vm1, %v508_v28, %v509_v32  ;;  %v3388_v39 = vld [vmem:[#allocation2 + $0x208] sm:$0xff]   ;;  %v3389_v41 = vld [vmem:[#allocation2 + $0x210] sm:$0xff]  }
  0x57   :  { %v3793_v25 = vsel %vm253_vm0, %v440_v15, %v444_v17 }
  0x58   :  { %v3776_v62 = vsel %vm253_vm0, %v428_v50, %v432_v56 }
  0x5b   :  { %1235 = vmatmul.mubr.bf16.gmra.mrb[20].mxu0 %v3540_v23 }
  0x5c   :  { %1242 = vmatprep.mubr.bf16.mxu0 %v3602_v13 }
  0x5d   :  { %1396 = vmatmul.mubr.bf16.gmra.mrb[20].mxu1 %v3597_v5 }
  0x5e   :  { %1403 = vmatprep.mubr.bf16.mxu1 %v3582_v53 }
  0x63   :  { %1243 = vmatmul.mubr.bf16.gmra.mrb[24].mxu0 %v3560_v36 }
  0x64   :  { %1250 = vmatprep.mubr.bf16.mxu0 %v3628_v30 }
  0x65   :  { %1404 = vmatmul.mubr.bf16.gmra.mrb[24].mxu1 %v3618_v27 }
  0x66   :  { %1411 = vmatprep.mubr.bf16.mxu1 %v3608_v16 }
  0x6b   :  { %1251 = vmatmul.mubr.bf16.gmra.mrb[28].mxu0 %v3582_v53 }
  0x6c   :  { %1258 = vmatprep.mubr.bf16.mxu0 %v3652_v54 }
  0x6d   :  { %1412 = vmatmul.mubr.bf16.gmra.mrb[28].mxu1 %v3641_v45 }
  0x6e   :  { %1419 = vmatprep.mubr.bf16.mxu1 %v3624_v29 }
  0x73   :  { %1259 = vmatmul.mubr.bf16.gmra.mrb[32].mxu0 %v3608_v16 }
  0x74   :  { %1266 = vmatprep.mubr.bf16.mxu0 %v3678_v19 }
  0x75   :  { %1420 = vmatmul.mubr.bf16.gmra.mrb[32].mxu1 %v3667_v9 }
  0x76   :  { %1427 = vmatprep.mubr.bf16.mxu1 %v3648_v49 }
  0x7b   :  { %1267 = vmatmul.mubr.bf16.gmra.mrb[36].mxu0 %v3624_v29 }
  0x7c   :  { %1274 = vmatprep.mubr.bf16.mxu0 %v3700_v46 }
  0x7d   :  { %1428 = vmatmul.mubr.bf16.gmra.mrb[36].mxu1 %v3694_v40 }
  0x7e   :  { %1435 = vmatprep.mubr.bf16.mxu1 %v3673_v11 }
  0x83   :  { %1275 = vmatmul.mubr.bf16.gmra.mrb[40].mxu0 %v3648_v49 }
  0x84   :  { %1282 = vmatprep.mubr.bf16.mxu0 %v3713_v55 }
  0x85   :  { %1436 = vmatmul.mubr.bf16.gmra.mrb[40].mxu1 %v3709_v52 }
  0x86   :  { %1443 = vmatprep.mubr.bf16.mxu1 %v3685_v26 }
  0x8b   :  { %1283 = vmatmul.mubr.bf16.gmra.mrb[44].mxu0 %v3673_v11 }
  0x8c   :  { %1290 = vmatprep.mubr.bf16.mxu0 %v3734_v14 }
  0x8d   :  { %1444 = vmatmul.mubr.bf16.gmra.mrb[44].mxu1 %v3730_v10 }
  0x8e   :  { %1451 = vmatprep.mubr.bf16.mxu1 %v3719_v60 }
  0x93   :  { %1291 = vmatmul.mubr.bf16.gmra.mrb[48].mxu0 %v3685_v26 }
  0x94   :  { %1298 = vmatprep.mubr.bf16.mxu0 %v3755_v37 }
  0x95   :  { %1452 = vmatmul.mubr.bf16.gmra.mrb[48].mxu1 %v3751_v35 }
  0x96   :  { %1459 = vmatprep.mubr.bf16.mxu1 %v3740_v18 }
  0x9b   :  { %1299 = vmatmul.mubr.bf16.gmra.mrb[52].mxu0 %v3719_v60 }
  0x9c   :  { %1306 = vmatprep.mubr.bf16.mxu0 %v3776_v62 }
  0x9d   :  { %1460 = vmatmul.mubr.bf16.gmra.mrb[52].mxu1 %v3772_v61 }
  0x9e   :  { %1467 = vmatprep.mubr.bf16.mxu1 %v3761_v43 }
  0xa3   :  { %1307 = vmatmul.mubr.bf16.gmra.mrb[56].mxu0 %v3740_v18 }
  0xa4   :  { %1314 = vmatprep.mubr.bf16.mxu0 %v3793_v25 }
  0xa5   :  { %1468 = vmatmul.mubr.bf16.gmra.mrb[56].mxu1 %v3784_v21 }
  0xa6   :  { %1475 = vmatprep.mubr.bf16.mxu1 %v3789_v22 }
  0xab   :  { %1315 = vmatmul.mubr.bf16.gmra.mrb[60].mxu0 %v3761_v43 }
  0xac   :  { %1516 = vmatprep.mubr.bf16.mxu0 %v3510_v3  ;;  %v3394_v3 = vld [vmem:[#allocation2 + $0x238] sm:$0xff]  }
  0xad   :  { %1476 = vmatmul.mubr.bf16.gmra.mrb[60].mxu1 %v3800_v33 }
  0xae   :  { %1677 = vmatprep.mubr.bf16.mxu1 %v3518_v8 }
  0xb3   :  { %1517 = vmatmul.mubr.bf16.vlgmr.msra.gmra.mrb[64].mxu0 %v3506_v0  ;;  %v3392_v0 = vld [vmem:[#allocation2 + $0x228] sm:$0xff]  }
  0xb4   :  { %3192 = vmatpush3.bf16.msra.mxu0 %v3688_v31  ;;  %1524 = vmatprep.mubr.bf16.mxu0 %v3534_v20 }
  0xb5   :  { %1678 = vmatmul.mubr.bf16.vlgmr.msra.gmra.mrb[64].mxu1 %v3490_v48  ;;  %3193 = vmatprep.subr.bf16.mxu0 %v3388_v39  ;;  %v3391_v48 = vld [vmem:[#allocation2 + $0x220] sm:$0xff]  }
  0xb6   :  { %1685 = vmatprep.mubr.bf16.mxu1 %v3544_v24 }
  0xb8   :  { %3194 = vmatpush3.bf16.msra.mxu0 %v3388_v39 }
  0xb9   :  { %3195 = vmatprep.subr.bf16.mxu0 %v3389_v41 }
  0xbb   :  { %1525 = vmatmul.mubr.bf16.gmra.mrb[68].mxu0 %v3518_v8 }
  0xbc   :  { %1532 = vmatprep.mubr.bf16.mxu0 %v3555_v34  ;;  %3196 = vmatpush3.bf16.msra.mxu0 %v3389_v41  ;;  %v3886_v41 = vld [vmem:[%s4250_s0 + $0xd4] ss:$0 sps:$4 sm:$0x11]  }
  0xbd   :  { %1686 = vmatmul.mubr.bf16.gmra.mrb[68].mxu1 %v3503_v63  ;;  %3197 = vmatprep.subr.bf16.mxu0 %v3390_v42  ;;  %v3393_v63 = vld [vmem:[#allocation2 + $0x230] sm:$0xff]  }
  0xbe   :  { %1693 = vmatprep.mubr.bf16.mxu1 %v3564_v38 }
  0xc0   :  { %3198 = vmatpush3.bf16.msra.mxu0 %v3390_v42  ;;  %v565_v42 = vshll.u32 %v3877_v2, 16 }
  0xc1   :  { %3199 = vmatprep.subr.bf16.mxu0 %v3391_v48 }
  0xc3   :  { %1533 = vmatmul.mubr.bf16.gmra.mrb[72].mxu0 %v3544_v24 }
  0xc4   :  { %1540 = vmatprep.mubr.bf16.mxu0 %v3576_v51  ;;  %3200 = vmatpush3.bf16.msra.mxu0 %v3391_v48 }
  0xc5   :  { %1694 = vmatmul.mubr.bf16.gmra.mrb[72].mxu1 %v3524_v12  ;;  %3201 = vmatprep.subr.bf16.mxu0 %v3392_v0 }
  0xc6   :  { %1701 = vmatprep.mubr.bf16.mxu1 %v3586_v58 }
  0xc8   :  { %3202 = vmatpush3.bf16.msra.mxu0 %v3392_v0 }
  0xc9   :  { %3203 = vmatprep.subr.bf16.mxu0 %v3393_v63 }
  0xcb   :  { %1541 = vmatmul.mubr.bf16.gmra.mrb[76].mxu0 %v3564_v38  ;;  %v3854_v38 = vld [vmem:[%s4252_s2] ss:$0 sm:$0xff] }
  0xcc   :  { %1548 = vmatprep.mubr.bf16.mxu0 %v3597_v5  ;;  %3204 = vmatpush3.bf16.msra.mxu0 %v3393_v63 }
  0xcd   :  { %1702 = vmatmul.mubr.bf16.gmra.mrb[76].mxu1 %v3540_v23  ;;  %3205 = vmatprep.subr.bf16.mxu0 %v3394_v3 }
  0xce   :  { %1709 = vmatprep.mubr.bf16.mxu1 %v3602_v13 }
  0xd0   :  { %3206 = vmatpush3.bf16.msra.mxu0 %v3394_v3 }
  0xd3   :  { %1549 = vmatmul.mubr.bf16.gmra.mrb[80].mxu0 %v3586_v58 }
  0xd4   :  { %1556 = vmatprep.mubr.bf16.mxu0 %v3618_v27 }
  0xd5   :  { %1710 = vmatmul.mubr.bf16.gmra.mrb[80].mxu1 %v3560_v36 }
  0xd6   :  { %1717 = vmatprep.mubr.bf16.mxu1 %v3628_v30 }
  0xdb   :  { %1557 = vmatmul.mubr.bf16.gmra.mrb[84].mxu0 %v3602_v13 }
  0xdc   :  { %1564 = vmatprep.mubr.bf16.mxu0 %v3641_v45 }
  0xdd   :  { %1718 = vmatmul.mubr.bf16.gmra.mrb[84].mxu1 %v3582_v53 }
  0xde   :  { %1725 = vmatprep.mubr.bf16.mxu1 %v3652_v54 }
  0xe3   :  { %1565 = vmatmul.mubr.bf16.gmra.mrb[88].mxu0 %v3628_v30 }
  0xe4   :  { %1572 = vmatprep.mubr.bf16.mxu0 %v3667_v9 }
  0xe5   :  { %1726 = vmatmul.mubr.bf16.gmra.mrb[88].mxu1 %v3608_v16 }
  0xe6   :  { %1733 = vmatprep.mubr.bf16.mxu1 %v3678_v19 }
  0xeb   :  { %1573 = vmatmul.mubr.bf16.gmra.mrb[92].mxu0 %v3652_v54 }
  0xec   :  { %1580 = vmatprep.mubr.bf16.mxu0 %v3694_v40 }
  0xed   :  { %1734 = vmatmul.mubr.bf16.gmra.mrb[92].mxu1 %v3624_v29 }
  0xee   :  { %1741 = vmatprep.mubr.bf16.mxu1 %v3700_v46 }
  0xf3   :  { %1581 = vmatmul.mubr.bf16.gmra.mrb[96].mxu0 %v3678_v19  ;;  %v539_v19 = vshll.u32 %v3789_v22, 16 }
  0xf4   :  { %1588 = vmatprep.mubr.bf16.mxu0 %v3709_v52 }
  0xf5   :  { %1742 = vmatmul.mubr.bf16.gmra.mrb[96].mxu1 %v3648_v49  ;;  %v541_v59 = vrot.slane %v539_v19, 1 }
  0xf6   :  { %1749 = vmatprep.mubr.bf16.mxu1 %v3713_v55 }
  0xf7   :  { %v542_v32 = vor.u32 %v541_v59, %v537_v57 }
  0xfb   :  { %1589 = vmatmul.mubr.bf16.gmra.mrb[100].mxu0 %v3700_v46 }
  0xfc   :  { %1596 = vmatprep.mubr.bf16.mxu0 %v3730_v10 }
  0xfd   :  { %1750 = vmatmul.mubr.bf16.gmra.mrb[100].mxu1 %v3673_v11  ;;  %v3863_v11 = vld [vmem:[%s4250_s0 + $0xc8] ss:$0 sps:$4 sm:$0x11]  }
  0xfe   :  { %1757 = vmatprep.mubr.bf16.mxu1 %v3734_v14  ;;  %v544_v1 = vshll.u32 %v3863_v11, 16 }
 0x100   :  { %v546_v39 = vrot.slane %v544_v1, 1 }
 0x103   :  { %1597 = vmatmul.mubr.bf16.gmra.mrb[104].mxu0 %v3713_v55 }
 0x104   :  { %1604 = vmatprep.mubr.bf16.mxu0 %v3751_v35 }
 0x105   :  { %1758 = vmatmul.mubr.bf16.gmra.mrb[104].mxu1 %v3685_v26 }
 0x106   :  { %1765 = vmatprep.mubr.bf16.mxu1 %v3755_v37  ;;  %v2711_v23 = vpop.f32.mrb[0].mxu0 }
 0x107   :  { %v2712_v53 = vpop.f32.mrb[1].mxu0 }
 0x108   :  { %v2823_v8 = vpop.f32.mrb[0].mxu1  ;;  %v2713_v13 = vadd.f32 %v2712_v53, %v2711_v23  ;;  %v2714_v16 = vpop.f32.mrb[2].mxu0  ;;  %v547_v53 = vsel %vm253_vm0, %v542_v32, %v546_v39 }
 0x109   :  { %v2824_v12 = vpop.f32.mrb[1].mxu1  ;;  %v2715_v30 = vpop.f32.mrb[3].mxu0 }
 0x10a   :  { %v2825_v24 = vadd.f32 %v2824_v12, %v2823_v8  ;;  %v2826_v36 = vpop.f32.mrb[2].mxu1  ;;  %v1197_v49 = vadd.f32 %v2713_v13, %v3854_v38  ;;  %v2716_v54 = vadd.f32 %v2715_v30, %v2714_v16  ;;  %v567_v13 = vrot.slane %v565_v42, 1 }
 0x10b   :  { %v2827_v58 = vpop.f32.mrb[3].mxu1  ;;  %1605 = vmatmul.mubr.bf16.gmra.mrb[108].mxu0 %v3734_v14  ;;  %v570_v16 = vshll.u32 %v3886_v41, 16 }
 0x10c   :  { %v2828_v29 = vadd.f32 %v2827_v58, %v2826_v36  ;;  %v1200_v26 = vadd.f32 %v2716_v54, %v3854_v38  ;;  %v3867_v31 = vadd.f32 %v2825_v24, %v1197_v49  ;;  %1612 = vmatprep.mubr.bf16.mxu0 %v3772_v61  ;;  %v563_v58 = vshrl.u32 %v3877_v2, 16 }
 0x10d   :  { %1766 = vmatmul.mubr.bf16.gmra.mrb[108].mxu1 %v3719_v60 }
 0x10e   :  { %1773 = vmatprep.mubr.bf16.mxu1 %v3776_v62  ;;  %v3870_v60 = vadd.f32 %v2828_v29, %v1200_v26  ;;  %v2717_v44 = vpop.f32.mrb[4].mxu0 }
 0x10f   :  { %v2718_v50 = vpop.f32.mrb[5].mxu0 }
 0x110   :  { %v2829_v46 = vpop.f32.mrb[4].mxu1  ;;  %v2719_v4 = vadd.f32 %v2718_v50, %v2717_v44  ;;  %v2720_v6 = vpop.f32.mrb[6].mxu0 }
 0x111   :  { %v2830_v55 = vpop.f32.mrb[5].mxu1  ;;  %v2721_v15 = vpop.f32.mrb[7].mxu0 }
 0x112   :  { %v2831_v47 = vadd.f32 %v2830_v55, %v2829_v46  ;;  %v2832_v14 = vpop.f32.mrb[6].mxu1  ;;  %v1205_v17 = vadd.f32 %v2719_v4, %v3854_v38  ;;  %v2722_v28 = vadd.f32 %v2721_v15, %v2720_v6  ;;  %v568_v46 = vor.u32 %v567_v13, %v563_v58 }
 0x113   :  { %v2833_v56 = vpop.f32.mrb[7].mxu1  ;;  %1613 = vmatmul.mubr.bf16.gmra.mrb[112].mxu0 %v3755_v37  ;;  %v3398_v37 = vld [vmem:[%s4253_s3] sm:$0xff]   ;;  %v572_v55 = vrot.slane %v570_v16, 1 }
 0x114   :  { %v2834_v7 = vadd.f32 %v2833_v56, %v2832_v14  ;;  %v1208_v48 = vadd.f32 %v2722_v28, %v3854_v38  ;;  %v3890_v0 = vadd.f32 %v2831_v47, %v1205_v17  ;;  %1620 = vmatprep.mubr.bf16.mxu0 %v3784_v21  ;;  %3239 = vmatprep.subr.bf16.mxu1 %v3398_v37  ;;  %v549_v56 = vrot.slane %v3789_v22, 1 }
 0x115   :  { %1774 = vmatmul.mubr.bf16.gmra.mrb[112].mxu1 %v3740_v18 }
 0x116   :  { %1781 = vmatprep.mubr.bf16.mxu1 %v3793_v25  ;;  %v3896_v3 = vadd.f32 %v2834_v7, %v1208_v48  ;;  %v2723_v8 = vpop.f32.mrb[8].mxu0  ;;  %3240 = vmatpush3.bf16.msra.mxu1 %v3398_v37  ;;  %v573_v7 = vsel %vm253_vm0, %v568_v46, %v572_v55 }
 0x117   :  { %v2724_v24 = vpop.f32.mrb[9].mxu0 }
 0x118   :  { %v2835_v18 = vpop.f32.mrb[8].mxu1  ;;  %v2725_v29 = vadd.f32 %v2724_v24, %v2723_v8  ;;  %v2726_v30 = vpop.f32.mrb[10].mxu0 }
 0x119   :  { %v2836_v63 = vpop.f32.mrb[9].mxu1  ;;  %v2727_v54 = vpop.f32.mrb[11].mxu0 }
 0x11a   :  { %v2837_v12 = vadd.f32 %v2836_v63, %v2835_v18  ;;  %v2838_v23 = vpop.f32.mrb[10].mxu1  ;;  %v1213_v19 = vadd.f32 %v2725_v29, %v3854_v38  ;;  %v2728_v26 = vadd.f32 %v2727_v54, %v2726_v30 }
 0x11b   :  { %v2839_v36 = vpop.f32.mrb[11].mxu1  ;;  %1621 = vmatmul.mubr.bf16.gmra.mrb[116].mxu0 %v3776_v62 }
 0x11c   :  { %v2840_v49 = vadd.f32 %v2839_v36, %v2838_v23  ;;  %v1216_v44 = vadd.f32 %v2728_v26, %v3854_v38  ;;  %v3905_v47 = vadd.f32 %v2837_v12, %v1213_v19  ;;  %1628 = vmatprep.mubr.bf16.mxu0 %v3800_v33 }
 0x11d   :  { %1782 = vmatmul.mubr.bf16.gmra.mrb[116].mxu1 %v3761_v43  ;;  %v550_v43 = vrot.slane %v3863_v11, 1 }
 0x11e   :  { %1789 = vmatprep.mubr.bf16.mxu1 %v547_v53  ;;  %v3910_v57 = vadd.f32 %v2840_v49, %v1216_v44  ;;  %v2729_v59 = vpop.f32.mrb[12].mxu0 }
 0x11f   :  { %v2730_v62 = vpop.f32.mrb[13].mxu0  ;;  %v3915_v39 = vsel %vm462_vm1, %v549_v56, %v550_v43 }
 0x120   :  { %v2841_v14 = vpop.f32.mrb[12].mxu1  ;;  %v2731_v15 = vadd.f32 %v2730_v62, %v2729_v59  ;;  %v2732_v17 = vpop.f32.mrb[14].mxu0 }
 0x121   :  { %v2842_v50 = vpop.f32.mrb[13].mxu1  ;;  %v2733_v32 = vpop.f32.mrb[15].mxu0 }
 0x122   :  { %v2843_v1 = vadd.f32 %v2842_v50, %v2841_v14  ;;  %v2844_v4 = vpop.f32.mrb[14].mxu1  ;;  %v1221_v11 = vadd.f32 %v2731_v15, %v3854_v38  ;;  %v2734_v42 = vadd.f32 %v2733_v32, %v2732_v17  ;;  %v3400_v17 = vld [vmem:[%s4253_s3 + $0x10] sm:$0xff]  }
 0x123   :  { %v2845_v6 = vpop.f32.mrb[15].mxu1  ;;  %1629 = vmatmul.mubr.bf16.gmra.mrb[120].mxu0 %v3793_v25 }
 0x124   :  { %v2846_v28 = vadd.f32 %v2845_v6, %v2844_v4  ;;  %v1224_v48 = vadd.f32 %v2734_v42, %v3854_v38  ;;  %v3920_v18 = vadd.f32 %v2843_v1, %v1221_v11  ;;  %1636 = vmatprep.mubr.bf16.mxu0 %v3915_v39 }
 0x125   :  { %1790 = vmatmul.mubr.bf16.gmra.mrb[120].mxu1 %v3789_v22  ;;  %v3399_v22 = vld [vmem:[%s4253_s3 + $0x8] sm:$0xff]  }
 0x126   :  { %1797 = vmatprep.mubr.bf16.mxu1 %v573_v7  ;;  %v3926_v8 = vadd.f32 %v2846_v28, %v1224_v48  ;;  %v2735_v12 = vpop.f32.mrb[16].mxu0  ;;  %3241 = vmatprep.subr.bf16.mxu1 %v3399_v22 }
 0x127   :  { %v2736_v36 = vpop.f32.mrb[17].mxu0  ;;  %3242 = vmatpush3.bf16.msra.mxu1 %v3399_v22 }
 0x128   :  { %v2847_v37 = vpop.f32.mrb[16].mxu1  ;;  %v2737_v58 = vadd.f32 %v2736_v36, %v2735_v12  ;;  %v2738_v13 = vpop.f32.mrb[18].mxu0  ;;  %3243 = vmatprep.subr.bf16.mxu1 %v3400_v17 }
 0x129   :  { %v2848_v63 = vpop.f32.mrb[17].mxu1  ;;  %v2739_v29 = vpop.f32.mrb[19].mxu0 }
 0x12a   :  { %v2849_v23 = vadd.f32 %v2848_v63, %v2847_v37  ;;  %v2850_v24 = vpop.f32.mrb[18].mxu1  ;;  %v1229_v30 = vadd.f32 %v2737_v58, %v3854_v38  ;;  %v2740_v49 = vadd.f32 %v2739_v29, %v2738_v13 }
 0x12b   :  { %v2851_v25 = vpop.f32.mrb[19].mxu1  ;;  %1637 = vmatmul.mubr.bf16.gmra.mrb[124].mxu0 %v547_v53  ;;  %3244 = vmatpush3.bf16.msra.mxu1 %v3400_v17 }
 0x12c   :  { %v2852_v16 = vadd.f32 %v2851_v25, %v2850_v24  ;;  %v1232_v54 = vadd.f32 %v2740_v49, %v3854_v38  ;;  %v3931_v19 = vadd.f32 %v2849_v23, %v1229_v30  ;;  %3207 = vmatprep.mubr.bf16.mxu0 %v3534_v20 }
 0x12d   :  { %1798 = vmatmul.mubr.bf16.gmra.mrb[124].mxu1 %v3877_v2 }
 0x12e   :  { %v3934_v55 = vadd.f32 %v2852_v16, %v1232_v54  ;;  %v2741_v44 = vpop.f32.mrb[20].mxu0 }
 0x12f   :  { %v2742_v56 = vpop.f32.mrb[21].mxu0 }
 0x130   :  { %v2853_v26 = vpop.f32.mrb[20].mxu1  ;;  %v2743_v59 = vadd.f32 %v2742_v56, %v2741_v44  ;;  %v2744_v1 = vpop.f32.mrb[22].mxu0 }
 0x131   :  { %v2854_v46 = vpop.f32.mrb[21].mxu1  ;;  %v2745_v62 = vpop.f32.mrb[23].mxu0 }
 0x132   :  { %v2855_v14 = vadd.f32 %v2854_v46, %v2853_v26  ;;  %v2856_v50 = vpop.f32.mrb[22].mxu1  ;;  %v1237_v53 = vadd.f32 %v2743_v59, %v3854_v38  ;;  %v2746_v6 = vadd.f32 %v2745_v62, %v2744_v1  ;;  %v3401_v1 = vld [vmem:[%s4253_s3 + $0x18] sm:$0xff]  }
 0x133   :  { %v2857_v43 = vpop.f32.mrb[23].mxu1  ;;  %3208 = vmatmul.mubr.bf16.vlgmr.msra.gmra.mrb[128].mxu0 %v3555_v34  ;;  %3245 = vmatprep.subr.bf16.mxu1 %v3401_v1 }
 0x134   :  { %v2858_v4 = vadd.f32 %v2857_v43, %v2856_v50  ;;  %v1240_v7 = vadd.f32 %v2746_v6, %v3854_v38  ;;  %v3939_v20 = vadd.f32 %v2855_v14, %v1237_v53  ;;  %3211 = vmatprep.mubr.bf16.mxu0 %v3576_v51  ;;  %3246 = vmatpush3.bf16.msra.mxu1 %v3401_v1 }
 0x136   :  { %v3945_v32 = vadd.f32 %v2858_v4, %v1240_v7  ;;  %v2747_v11 = vpop.f32.mrb[24].mxu0 }
 0x137   :  { %v2748_v37 = vpop.f32.mrb[25].mxu0 }
 0x138   :  { %v2859_v15 = vpop.f32.mrb[24].mxu1  ;;  %v2749_v22 = vadd.f32 %v2748_v37, %v2747_v11  ;;  %v2750_v63 = vpop.f32.mrb[26].mxu0 }
 0x139   :  { %v2860_v28 = vpop.f32.mrb[25].mxu1  ;;  %v2751_v23 = vpop.f32.mrb[27].mxu0 }
 0x13a   :  { %v2861_v42 = vadd.f32 %v2860_v28, %v2859_v15  ;;  %v2862_v48 = vpop.f32.mrb[26].mxu1  ;;  %v1245_v51 = vadd.f32 %v2749_v22, %v3854_v38  ;;  %v2752_v24 = vadd.f32 %v2751_v23, %v2750_v63 }
 0x13b   :  { %v2863_v34 = vpop.f32.mrb[27].mxu1  ;;  %3212 = vmatmul.mubr.bf16.gmra.mrb[132].mxu0 %v3597_v5 }
 0x13c   :  { %v2864_v12 = vadd.f32 %v2863_v34, %v2862_v48  ;;  %v1248_v36 = vadd.f32 %v2752_v24, %v3854_v38  ;;  %v3950_v25 = vadd.f32 %v2861_v42, %v1245_v51  ;;  %3215 = vmatprep.mubr.bf16.mxu0 %v3618_v27 }
 0x13e   :  { %v3953_v16 = vadd.f32 %v2864_v12, %v1248_v36  ;;  %v2753_v29 = vpop.f32.mrb[28].mxu0 }
 0x13f   :  { %v2754_v54 = vpop.f32.mrb[29].mxu0 }
 0x140   :  { %v2865_v58 = vpop.f32.mrb[28].mxu1  ;;  %v2755_v46 = vadd.f32 %v2754_v54, %v2753_v29  ;;  %v2756_v44 = vpop.f32.mrb[30].mxu0 }
 0x141   :  { %v2866_v13 = vpop.f32.mrb[29].mxu1  ;;  %v2757_v50 = vpop.f32.mrb[31].mxu0 }
 0x142   :  { %v2867_v30 = vadd.f32 %v2866_v13, %v2865_v58  ;;  %v2868_v49 = vpop.f32.mrb[30].mxu1  ;;  %v1253_v5 = vadd.f32 %v2755_v46, %v3854_v38  ;;  %v2758_v56 = vadd.f32 %v2757_v50, %v2756_v44  ;;  %v3402_v44 = vld [vmem:[%s4253_s3 + $0x20] sm:$0xff]  }
 0x143   :  { %v2869_v26 = vpop.f32.mrb[31].mxu1  ;;  %3216 = vmatmul.mubr.bf16.gmra.mrb[136].mxu0 %v3641_v45  ;;  %3247 = vmatprep.subr.bf16.mxu1 %v3402_v44 }
 0x144   :  { %v2870_v14 = vadd.f32 %v2869_v26, %v2868_v49  ;;  %v1256_v43 = vadd.f32 %v2758_v56, %v3854_v38  ;;  %v3958_v27 = vadd.f32 %v2867_v30, %v1253_v5  ;;  %3219 = vmatprep.mubr.bf16.mxu0 %v3667_v9  ;;  %3248 = vmatpush3.bf16.msra.mxu1 %v3402_v44 }
 0x146   :  { %v3964_v62 = vadd.f32 %v2870_v14, %v1256_v43  ;;  %v2759_v53 = vpop.f32.mrb[32].mxu0 }
 0x147   :  { %v2760_v15 = vpop.f32.mrb[33].mxu0 }
 0x148   :  { %v2871_v59 = vpop.f32.mrb[32].mxu1  ;;  %v2761_v17 = vadd.f32 %v2760_v15, %v2759_v53  ;;  %v2762_v28 = vpop.f32.mrb[34].mxu0 }
 0x149   :  { %v2872_v4 = vpop.f32.mrb[33].mxu1  ;;  %v2763_v42 = vpop.f32.mrb[35].mxu0 }
 0x14a   :  { %v2873_v6 = vadd.f32 %v2872_v4, %v2871_v59  ;;  %v2874_v7 = vpop.f32.mrb[34].mxu1  ;;  %v1261_v9 = vadd.f32 %v2761_v17, %v3854_v38  ;;  %v2764_v48 = vadd.f32 %v2763_v42, %v2762_v28 }
 0x14b   :  { %v2875_v45 = vpop.f32.mrb[35].mxu1  ;;  %3220 = vmatmul.mubr.bf16.gmra.mrb[140].mxu0 %v3694_v40 }
 0x14c   :  { %v2876_v11 = vadd.f32 %v2875_v45, %v2874_v7  ;;  %v1264_v37 = vadd.f32 %v2764_v48, %v3854_v38  ;;  %v3969_v34 = vadd.f32 %v2873_v6, %v1261_v9  ;;  %3223 = vmatprep.mubr.bf16.mxu0 %v3709_v52 }
 0x14e   :  { %v3972_v12 = vadd.f32 %v2876_v11, %v1264_v37  ;;  %v2765_v23 = vpop.f32.mrb[36].mxu0 }
 0x14f   :  { %v2766_v36 = vpop.f32.mrb[37].mxu0 }
 0x150   :  { %v2877_v22 = vpop.f32.mrb[36].mxu1  ;;  %v2767_v13 = vadd.f32 %v2766_v36, %v2765_v23  ;;  %v2768_v29 = vpop.f32.mrb[38].mxu0 }
 0x151   :  { %v2878_v63 = vpop.f32.mrb[37].mxu1  ;;  %v2769_v49 = vpop.f32.mrb[39].mxu0 }
 0x152   :  { %v2879_v51 = vadd.f32 %v2878_v63, %v2877_v22  ;;  %v2880_v24 = vpop.f32.mrb[38].mxu1  ;;  %v1269_v40 = vadd.f32 %v2767_v13, %v3854_v38  ;;  %v2770_v54 = vadd.f32 %v2769_v49, %v2768_v29  ;;  %v575_v29 = vrot.slane %v3877_v2, 1  ;;  %v3403_v49 = vld [vmem:[%s4253_s3 + $0x28] sm:$0xff]  }
 0x153   :  { %v2881_v58 = vpop.f32.mrb[39].mxu1  ;;  %3224 = vmatmul.mubr.bf16.gmra.mrb[144].mxu0 %v3730_v10  ;;  %3249 = vmatprep.subr.bf16.mxu1 %v3403_v49 }
 0x154   :  { %v2882_v30 = vadd.f32 %v2881_v58, %v2880_v24  ;;  %v1272_v26 = vadd.f32 %v2770_v54, %v3854_v38  ;;  %v3977_v52 = vadd.f32 %v2879_v51, %v1269_v40  ;;  %3227 = vmatprep.mubr.bf16.mxu0 %v3751_v35  ;;  %3250 = vmatpush3.bf16.msra.mxu1 %v3403_v49 }
 0x156   :  { %v3983_v50 = vadd.f32 %v2882_v30, %v1272_v26  ;;  %v2771_v5 = vpop.f32.mrb[40].mxu0  ;;  %v576_v30 = vrot.slane %v3886_v41, 1 }
 0x157   :  { %v2772_v59 = vpop.f32.mrb[41].mxu0 }
 0x158   :  { %v2883_v46 = vpop.f32.mrb[40].mxu1  ;;  %v2773_v1 = vadd.f32 %v2772_v59, %v2771_v5  ;;  %v2774_v4 = vpop.f32.mrb[42].mxu0  ;;  %v577_v2 = vsel %vm462_vm1, %v575_v29, %v576_v30 }
 0x159   :  { %v2884_v14 = vpop.f32.mrb[41].mxu1  ;;  %v2775_v6 = vpop.f32.mrb[43].mxu0 }
 0x15a   :  { %v2885_v56 = vadd.f32 %v2884_v14, %v2883_v46  ;;  %v2886_v43 = vpop.f32.mrb[42].mxu1  ;;  %v1277_v35 = vadd.f32 %v2773_v1, %v3854_v38  ;;  %v2776_v7 = vadd.f32 %v2775_v6, %v2774_v4 }
 0x15b   :  { %v2887_v10 = vpop.f32.mrb[43].mxu1  ;;  %3228 = vmatmul.mubr.bf16.gmra.mrb[148].mxu0 %v3772_v61 }
 0x15c   :  { %v2888_v53 = vadd.f32 %v2887_v10, %v2886_v43  ;;  %v1280_v15 = vadd.f32 %v2776_v7, %v3854_v38  ;;  %v3988_v45 = vadd.f32 %v2885_v56, %v1277_v35  ;;  %3231 = vmatprep.mubr.bf16.mxu0 %v3784_v21 }
 0x15e   :  { %v3991_v11 = vadd.f32 %v2888_v53, %v1280_v15  ;;  %v2777_v42 = vpop.f32.mrb[44].mxu0 }
 0x15f   :  { %v2778_v37 = vpop.f32.mrb[45].mxu0 }
 0x160   :  { %v2889_v17 = vpop.f32.mrb[44].mxu1  ;;  %v2779_v63 = vadd.f32 %v2778_v37, %v2777_v42  ;;  %v2780_v23 = vpop.f32.mrb[46].mxu0 }
 0x161   :  { %v2890_v28 = vpop.f32.mrb[45].mxu1  ;;  %v2781_v24 = vpop.f32.mrb[47].mxu0 }
 0x162   :  { %v2891_v9 = vadd.f32 %v2890_v28, %v2889_v17  ;;  %v2892_v48 = vpop.f32.mrb[46].mxu1  ;;  %v1285_v61 = vadd.f32 %v2779_v63, %v3854_v38  ;;  %v2782_v36 = vadd.f32 %v2781_v24, %v2780_v23 }
 0x163   :  { %v2893_v22 = vpop.f32.mrb[47].mxu1  ;;  %3232 = vmatmul.mubr.bf16.gmra.mrb[152].mxu0 %v3800_v33 }
 0x164   :  { %v2894_v51 = vadd.f32 %v2893_v22, %v2892_v48  ;;  %v1288_v58 = vadd.f32 %v2782_v36, %v3854_v38  ;;  %v3996_v21 = vadd.f32 %v2891_v9, %v1285_v61  ;;  %3235 = vmatprep.mubr.bf16.mxu0 %v3915_v39  ;;  %v3404_v61 = vld [vmem:[%s4253_s3 + $0x30] sm:$0xff]  }
 0x165   :  { %3251 = vmatprep.subr.bf16.mxu1 %v3404_v61 }
 0x166   :  { %v4004_v54 = vadd.f32 %v2894_v51, %v1288_v58  ;;  %v2783_v26 = vpop.f32.mrb[48].mxu0  ;;  %3252 = vmatpush3.bf16.msra.mxu1 %v3404_v61 }
 0x167   :  { %v2784_v44 = vpop.f32.mrb[49].mxu0 }
 0x168   :  { %v2895_v13 = vpop.f32.mrb[48].mxu1  ;;  %v2785_v5 = vadd.f32 %v2784_v44, %v2783_v26  ;;  %v2786_v39 = vpop.f32.mrb[50].mxu0 }
 0x169   :  { %v2896_v40 = vpop.f32.mrb[49].mxu1  ;;  %v2787_v41 = vpop.f32.mrb[51].mxu0 }
 0x16a   :  { %v2897_v33 = vadd.f32 %v2896_v40, %v2895_v13  ;;  %v2898_v46 = vpop.f32.mrb[50].mxu1  ;;  %v1293_v43 = vadd.f32 %v2785_v5, %v3854_v38  ;;  %v2788_v59 = vadd.f32 %v2787_v41, %v2786_v39 }
 0x16b   :  { %v2899_v14 = vpop.f32.mrb[51].mxu1  ;;  %3236 = vmatmul.mubr.bf16.gmra.mrb[156].mxu0 %v577_v2 }
 0x16c   :  { %v2900_v56 = vadd.f32 %v2899_v14, %v2898_v46  ;;  %v1296_v10 = vadd.f32 %v2788_v59, %v3854_v38  ;;  %v4009_v1 = vadd.f32 %v2897_v33, %v1293_v43 }
 0x16e   :  { %v4011_v6 = vadd.f32 %v2900_v56, %v1296_v10  ;;  %v2789_v35 = vpop.f32.mrb[52].mxu0 }
 0x16f   :  { %v2790_v17 = vpop.f32.mrb[53].mxu0 }
 0x170   :  { %v2901_v4 = vpop.f32.mrb[52].mxu1  ;;  %v2791_v42 = vadd.f32 %v2790_v17, %v2789_v35  ;;  %v2792_v9 = vpop.f32.mrb[54].mxu0 }
 0x171   :  { %v2902_v53 = vpop.f32.mrb[53].mxu1  ;;  %v2793_v37 = vpop.f32.mrb[55].mxu0 }
 0x172   :  { %v2903_v7 = vadd.f32 %v2902_v53, %v2901_v4  ;;  %v2904_v15 = vpop.f32.mrb[54].mxu1  ;;  %v1301_v22 = vadd.f32 %v2791_v42, %v3854_v38  ;;  %v2794_v63 = vadd.f32 %v2793_v37, %v2792_v9 }
 0x173   :  { %v2905_v28 = vpop.f32.mrb[55].mxu1 }
 0x174   :  { %v2906_v48 = vadd.f32 %v2905_v28, %v2904_v15  ;;  %v1304_v23 = vadd.f32 %v2794_v63, %v3854_v38  ;;  %v4015_v51 = vadd.f32 %v2903_v7, %v1301_v22  ;;  %v3405_v63 = vld [vmem:[%s4253_s3 + $0x38] sm:$0xff]  }
 0x175   :  { %3253 = vmatprep.subr.bf16.mxu1 %v3405_v63 }
 0x176   :  { %v4020_v58 = vadd.f32 %v2906_v48, %v1304_v23  ;;  %v2795_v13 = vpop.f32.mrb[56].mxu0  ;;  %3254 = vmatpush3.bf16.msra.mxu1 %v3405_v63 }
 0x177   :  { %v2796_v49 = vpop.f32.mrb[57].mxu0 }
 0x178   :  { %v2907_v24 = vpop.f32.mrb[56].mxu1  ;;  %v2797_v26 = vadd.f32 %v2796_v49, %v2795_v13  ;;  %v2798_v33 = vpop.f32.mrb[58].mxu0 }
 0x179   :  { %v2908_v36 = vpop.f32.mrb[57].mxu1  ;;  %v2799_v44 = vpop.f32.mrb[59].mxu0 }
 0x17a   :  { %v2909_v29 = vadd.f32 %v2908_v36, %v2907_v24  ;;  %v2910_v30 = vpop.f32.mrb[58].mxu1  ;;  %v1309_v14 = vadd.f32 %v2797_v26, %v3854_v38  ;;  %v2800_v5 = vadd.f32 %v2799_v44, %v2798_v33 }
 0x17b   :  { %v2911_v40 = vpop.f32.mrb[59].mxu1 }
 0x17c   :  { %v2912_v46 = vadd.f32 %v2911_v40, %v2910_v30  ;;  %v1312_v39 = vadd.f32 %v2800_v5, %v3854_v38  ;;  %v4024_v56 = vadd.f32 %v2909_v29, %v1309_v14 }
 0x17e   :  { %v4026_v43 = vadd.f32 %v2912_v46, %v1312_v39  ;;  %v2801_v59 = vpop.f32.mrb[60].mxu0 }
 0x17f   :  { %v2802_v53 = vpop.f32.mrb[61].mxu0 }
 0x180   :  { %v2913_v2 = vpop.f32.mrb[60].mxu1  ;;  %v2803_v7 = vadd.f32 %v2802_v53, %v2801_v59  ;;  %v2804_v15 = vpop.f32.mrb[62].mxu0 }
 0x181   :  { %v2914_v41 = vpop.f32.mrb[61].mxu1  ;;  %v2805_v28 = vpop.f32.mrb[63].mxu0 }
 0x182   :  { %v2915_v10 = vadd.f32 %v2914_v41, %v2913_v2  ;;  %v2916_v4 = vpop.f32.mrb[62].mxu1  ;;  %v1317_v42 = vadd.f32 %v2803_v7, %v3854_v38  ;;  %v2806_v9 = vadd.f32 %v2805_v28, %v2804_v15 }
 0x183   :  { %v2917_v35 = vpop.f32.mrb[63].mxu1 }
 0x184   :  { %v2918_v17 = vadd.f32 %v2917_v35, %v2916_v4  ;;  %v1320_v48 = vadd.f32 %v2806_v9, %v3854_v38  ;;  %v4030_v37 = vadd.f32 %v2915_v10, %v1317_v42 }
 0x186   :  { %v4035_v24 = vadd.f32 %v2918_v17, %v1320_v48  ;;  %v2935_v61 = vpop.f32.mrb[64].mxu0 }
 0x187   :  { %v2936_v29 = vpop.f32.mrb[65].mxu0 }
 0x188   :  { %v3047_v22 = vpop.f32.mrb[64].mxu1  ;;  %v2937_v49 = vadd.f32 %v2936_v29, %v2935_v61  ;;  %v2938_v40 = vpop.f32.mrb[66].mxu0 }
 0x189   :  { %v3048_v23 = vpop.f32.mrb[65].mxu1  ;;  %v2939_v26 = vpop.f32.mrb[67].mxu0 }
 0x18a   :  { %v3049_v36 = vadd.f32 %v3048_v23, %v3047_v22  ;;  %v3050_v13 = vpop.f32.mrb[66].mxu1  ;;  %v1519_v33 = vadd.f32 %v2937_v49, %v3867_v31  ;;  %v2940_v46 = vadd.f32 %v2939_v26, %v2938_v40 }
 0x18b   :  { %v3051_v30 = vpop.f32.mrb[67].mxu1 }
 0x18c   :  { %v3052_v38 = vadd.f32 %v3051_v30, %v3050_v13  ;;  %v1522_v44 = vadd.f32 %v2940_v46, %v3870_v60  ;;  %v4039_v5 = vadd.f32 %v3049_v36, %v1519_v33 }
 0x18e   :  { %v2941_v2 = vpop.f32.mrb[68].mxu0  ;;  %v4041_v10 = vadd.f32 %v3052_v38, %v1522_v44 }
 0x18f   :  { %v2942_v4 = vpop.f32.mrb[69].mxu0 }
 0x190   :  { %v3053_v14 = vpop.f32.mrb[68].mxu1  ;;  %v2943_v35 = vadd.f32 %v2942_v4, %v2941_v2  ;;  %v2944_v7 = vpop.f32.mrb[70].mxu0 }
 0x191   :  { %v3054_v39 = vpop.f32.mrb[69].mxu1  ;;  %v2945_v17 = vpop.f32.mrb[71].mxu0 }
 0x192   :  { %v3055_v41 = vadd.f32 %v3054_v39, %v3053_v14  ;;  %v3056_v59 = vpop.f32.mrb[70].mxu1  ;;  %v1527_v31 = vadd.f32 %v2943_v35, %v3890_v0  ;;  %v2946_v28 = vadd.f32 %v2945_v17, %v2944_v7 }
 0x193   :  { %v3057_v53 = vpop.f32.mrb[71].mxu1 }
 0x194   :  { %v3058_v15 = vadd.f32 %v3057_v53, %v3056_v59  ;;  %v1530_v60 = vadd.f32 %v2946_v28, %v3896_v3  ;;  %v4045_v9 = vadd.f32 %v3055_v41, %v1527_v31 }
 0x196   :  { %v2947_v22 = vpop.f32.mrb[72].mxu0  ;;  %v4047_v61 = vadd.f32 %v3058_v15, %v1530_v60 }
 0x197   :  { %v2948_v36 = vpop.f32.mrb[73].mxu0 }
 0x198   :  { %v3059_v42 = vpop.f32.mrb[72].mxu1  ;;  %v2949_v29 = vadd.f32 %v2948_v36, %v2947_v22  ;;  %v2950_v30 = vpop.f32.mrb[74].mxu0 }
 0x199   :  { %v3060_v48 = vpop.f32.mrb[73].mxu1  ;;  %v2951_v40 = vpop.f32.mrb[75].mxu0 }
 0x19a   :  { %v3061_v63 = vadd.f32 %v3060_v48, %v3059_v42  ;;  %v3062_v23 = vpop.f32.mrb[74].mxu1  ;;  %v1535_v0 = vadd.f32 %v2949_v29, %v3905_v47  ;;  %v2952_v38 = vadd.f32 %v2951_v40, %v2950_v30 }
 0x19b   :  { %v3063_v13 = vpop.f32.mrb[75].mxu1 }
 0x19c   :  { %v3064_v49 = vadd.f32 %v3063_v13, %v3062_v23  ;;  %v1538_v3 = vadd.f32 %v2952_v38, %v3910_v57  ;;  %v4051_v33 = vadd.f32 %v3061_v63, %v1535_v0 }
 0x19e   :  { %v2953_v44 = vpop.f32.mrb[76].mxu0  ;;  %v4053_v2 = vadd.f32 %v3064_v49, %v1538_v3 }
 0x19f   :  { %v2954_v41 = vpop.f32.mrb[77].mxu0 }
 0x1a0   :  { %v3065_v26 = vpop.f32.mrb[76].mxu1  ;;  %v2955_v4 = vadd.f32 %v2954_v41, %v2953_v44  ;;  %v2956_v53 = vpop.f32.mrb[78].mxu0 }
 0x1a1   :  { %v3066_v46 = vpop.f32.mrb[77].mxu1  ;;  %v2957_v7 = vpop.f32.mrb[79].mxu0 }
 0x1a2   :  { %v3067_v14 = vadd.f32 %v3066_v46, %v3065_v26  ;;  %v3068_v39 = vpop.f32.mrb[78].mxu1  ;;  %v1543_v47 = vadd.f32 %v2955_v4, %v3920_v18  ;;  %v2958_v15 = vadd.f32 %v2957_v7, %v2956_v53 }
 0x1a3   :  { %v3069_v59 = vpop.f32.mrb[79].mxu1 }
 0x1a4   :  { %v3070_v35 = vadd.f32 %v3069_v59, %v3068_v39  ;;  %v1546_v57 = vadd.f32 %v2958_v15, %v3926_v8  ;;  %v4057_v31 = vadd.f32 %v3067_v14, %v1543_v47 }
 0x1a6   :  { %v2959_v60 = vpop.f32.mrb[80].mxu0  ;;  %v4059_v22 = vadd.f32 %v3070_v35, %v1546_v57 }
 0x1a7   :  { %v2960_v63 = vpop.f32.mrb[81].mxu0 }
 0x1a8   :  { %v3071_v17 = vpop.f32.mrb[80].mxu1  ;;  %v2961_v36 = vadd.f32 %v2960_v63, %v2959_v60  ;;  %v2962_v13 = vpop.f32.mrb[82].mxu0 }
 0x1a9   :  { %v3072_v28 = vpop.f32.mrb[81].mxu1  ;;  %v2963_v30 = vpop.f32.mrb[83].mxu0 }
 0x1aa   :  { %v3073_v42 = vadd.f32 %v3072_v28, %v3071_v17  ;;  %v3074_v48 = vpop.f32.mrb[82].mxu1  ;;  %v1551_v18 = vadd.f32 %v2961_v36, %v3931_v19  ;;  %v2964_v49 = vadd.f32 %v2963_v30, %v2962_v13 }
 0x1ab   :  { %v3075_v23 = vpop.f32.mrb[83].mxu1 }
 0x1ac   :  { %v3076_v29 = vadd.f32 %v3075_v23, %v3074_v48  ;;  %v1554_v8 = vadd.f32 %v2964_v49, %v3934_v55  ;;  %v4063_v0 = vadd.f32 %v3073_v42, %v1551_v18 }
 0x1ae   :  { %v2965_v3 = vpop.f32.mrb[84].mxu0  ;;  %v4065_v44 = vadd.f32 %v3076_v29, %v1554_v8 }
 0x1af   :  { %v2966_v14 = vpop.f32.mrb[85].mxu0 }
 0x1b0   :  { %v3077_v40 = vpop.f32.mrb[84].mxu1  ;;  %v2967_v41 = vadd.f32 %v2966_v14, %v2965_v3  ;;  %v2968_v59 = vpop.f32.mrb[86].mxu0 }
 0x1b1   :  { %v3078_v38 = vpop.f32.mrb[85].mxu1  ;;  %v2969_v53 = vpop.f32.mrb[87].mxu0 }
 0x1b2   :  { %v3079_v26 = vadd.f32 %v3078_v38, %v3077_v40  ;;  %v3080_v46 = vpop.f32.mrb[86].mxu1  ;;  %v1559_v19 = vadd.f32 %v2967_v41, %v3939_v20  ;;  %v2970_v35 = vadd.f32 %v2969_v53, %v2968_v59 }
 0x1b3   :  { %v3081_v39 = vpop.f32.mrb[87].mxu1 }
 0x1b4   :  { %v3082_v4 = vadd.f32 %v3081_v39, %v3080_v46  ;;  %v1562_v55 = vadd.f32 %v2970_v35, %v3945_v32  ;;  %v4069_v47 = vadd.f32 %v3079_v26, %v1559_v19 }
 0x1b6   :  { %v2971_v57 = vpop.f32.mrb[88].mxu0  ;;  %v4071_v60 = vadd.f32 %v3082_v4, %v1562_v55 }
 0x1b7   :  { %v2972_v42 = vpop.f32.mrb[89].mxu0 }
 0x1b8   :  { %v3083_v7 = vpop.f32.mrb[88].mxu1  ;;  %v2973_v63 = vadd.f32 %v2972_v42, %v2971_v57  ;;  %v2974_v23 = vpop.f32.mrb[90].mxu0 }
 0x1b9   :  { %v3084_v15 = vpop.f32.mrb[89].mxu1  ;;  %v2975_v13 = vpop.f32.mrb[91].mxu0 }
 0x1ba   :  { %v3085_v17 = vadd.f32 %v3084_v15, %v3083_v7  ;;  %v3086_v28 = vpop.f32.mrb[90].mxu1  ;;  %v1567_v20 = vadd.f32 %v2973_v63, %v3950_v25  ;;  %v2976_v29 = vadd.f32 %v2975_v13, %v2974_v23 }
 0x1bb   :  { %v3087_v48 = vpop.f32.mrb[91].mxu1 }
 0x1bc   :  { %v3088_v36 = vadd.f32 %v3087_v48, %v3086_v28  ;;  %v1570_v32 = vadd.f32 %v2976_v29, %v3953_v16  ;;  %v4075_v18 = vadd.f32 %v3085_v17, %v1567_v20 }
 0x1be   :  { %v2977_v8 = vpop.f32.mrb[92].mxu0  ;;  %v4077_v3 = vadd.f32 %v3088_v36, %v1570_v32 }
 0x1bf   :  { %v2978_v26 = vpop.f32.mrb[93].mxu0 }
 0x1c0   :  { %v3089_v30 = vpop.f32.mrb[92].mxu1  ;;  %v2979_v14 = vadd.f32 %v2978_v26, %v2977_v8  ;;  %v2980_v39 = vpop.f32.mrb[94].mxu0 }
 0x1c1   :  { %v3090_v49 = vpop.f32.mrb[93].mxu1  ;;  %v2981_v59 = vpop.f32.mrb[95].mxu0 }
 0x1c2   :  { %v3091_v40 = vadd.f32 %v3090_v49, %v3089_v30  ;;  %v3092_v38 = vpop.f32.mrb[94].mxu1  ;;  %v1575_v25 = vadd.f32 %v2979_v14, %v3958_v27  ;;  %v2982_v4 = vadd.f32 %v2981_v59, %v2980_v39 }
 0x1c3   :  { %v3093_v46 = vpop.f32.mrb[95].mxu1 }
 0x1c4   :  { %v3094_v41 = vadd.f32 %v3093_v46, %v3092_v38  ;;  %v1578_v16 = vadd.f32 %v2982_v4, %v3964_v62  ;;  %v4081_v19 = vadd.f32 %v3091_v40, %v1575_v25 }
 0x1c6   :  { %v2983_v55 = vpop.f32.mrb[96].mxu0  ;;  %v4083_v57 = vadd.f32 %v3094_v41, %v1578_v16 }
 0x1c7   :  { %v2984_v17 = vpop.f32.mrb[97].mxu0 }
 0x1c8   :  { %v3095_v53 = vpop.f32.mrb[96].mxu1  ;;  %v2985_v42 = vadd.f32 %v2984_v17, %v2983_v55  ;;  %v2986_v48 = vpop.f32.mrb[98].mxu0 }
 0x1c9   :  { %v3096_v35 = vpop.f32.mrb[97].mxu1  ;;  %v2987_v23 = vpop.f32.mrb[99].mxu0 }
 0x1ca   :  { %v3097_v7 = vadd.f32 %v3096_v35, %v3095_v53  ;;  %v3098_v15 = vpop.f32.mrb[98].mxu1  ;;  %v1583_v27 = vadd.f32 %v2985_v42, %v3969_v34  ;;  %v2988_v36 = vadd.f32 %v2987_v23, %v2986_v48 }
 0x1cb   :  { %v3099_v28 = vpop.f32.mrb[99].mxu1 }
 0x1cc   :  { %v3100_v63 = vadd.f32 %v3099_v28, %v3098_v15  ;;  %v1586_v62 = vadd.f32 %v2988_v36, %v3972_v12  ;;  %v4087_v20 = vadd.f32 %v3097_v7, %v1583_v27 }
 0x1ce   :  { %v2989_v32 = vpop.f32.mrb[100].mxu0  ;;  %v4089_v8 = vadd.f32 %v3100_v63, %v1586_v62 }
 0x1cf   :  { %v2990_v40 = vpop.f32.mrb[101].mxu0 }
 0x1d0   :  { %v3101_v13 = vpop.f32.mrb[100].mxu1  ;;  %v2991_v26 = vadd.f32 %v2990_v40, %v2989_v32  ;;  %v2992_v46 = vpop.f32.mrb[102].mxu0 }
 0x1d1   :  { %v3102_v29 = vpop.f32.mrb[101].mxu1  ;;  %v2993_v39 = vpop.f32.mrb[103].mxu0 }
 0x1d2   :  { %v3103_v30 = vadd.f32 %v3102_v29, %v3101_v13  ;;  %v3104_v49 = vpop.f32.mrb[102].mxu1  ;;  %v1591_v34 = vadd.f32 %v2991_v26, %v3977_v52  ;;  %v2994_v41 = vadd.f32 %v2993_v39, %v2992_v46 }
 0x1d3   :  { %v3105_v38 = vpop.f32.mrb[103].mxu1 }
 0x1d4   :  { %v3106_v14 = vadd.f32 %v3105_v38, %v3104_v49  ;;  %v1594_v12 = vadd.f32 %v2994_v41, %v3983_v50  ;;  %v4093_v25 = vadd.f32 %v3103_v30, %v1591_v34 }
 0x1d6   :  { %v2995_v16 = vpop.f32.mrb[104].mxu0  ;;  %v4095_v55 = vadd.f32 %v3106_v14, %v1594_v12 }
 0x1d7   :  { %v2996_v7 = vpop.f32.mrb[105].mxu0 }
 0x1d8   :  { %v3107_v59 = vpop.f32.mrb[104].mxu1  ;;  %v2997_v17 = vadd.f32 %v2996_v7, %v2995_v16  ;;  %v2998_v28 = vpop.f32.mrb[106].mxu0 }
 0x1d9   :  { %v3108_v4 = vpop.f32.mrb[105].mxu1  ;;  %v2999_v48 = vpop.f32.mrb[107].mxu0 }
 0x1da   :  { %v3109_v53 = vadd.f32 %v3108_v4, %v3107_v59  ;;  %v3110_v35 = vpop.f32.mrb[106].mxu1  ;;  %v1599_v52 = vadd.f32 %v2997_v17, %v3988_v45  ;;  %v3000_v63 = vadd.f32 %v2999_v48, %v2998_v28 }
 0x1db   :  { %v3111_v15 = vpop.f32.mrb[107].mxu1 }
 0x1dc   :  { %v3112_v42 = vadd.f32 %v3111_v15, %v3110_v35  ;;  %v1602_v50 = vadd.f32 %v3000_v63, %v3991_v11  ;;  %v4099_v27 = vadd.f32 %v3109_v53, %v1599_v52 }
 0x1de   :  { %v3001_v62 = vpop.f32.mrb[108].mxu0  ;;  %v4101_v32 = vadd.f32 %v3112_v42, %v1602_v50 }
 0x1df   :  { %v3002_v30 = vpop.f32.mrb[109].mxu0 }
 0x1e0   :  { %v3113_v23 = vpop.f32.mrb[108].mxu1  ;;  %v3003_v40 = vadd.f32 %v3002_v30, %v3001_v62  ;;  %v3004_v38 = vpop.f32.mrb[110].mxu0 }
 0x1e1   :  { %v3114_v36 = vpop.f32.mrb[109].mxu1  ;;  %v3005_v46 = vpop.f32.mrb[111].mxu0 }
 0x1e2   :  { %v3115_v13 = vadd.f32 %v3114_v36, %v3113_v23  ;;  %v3116_v29 = vpop.f32.mrb[110].mxu1  ;;  %v1607_v45 = vadd.f32 %v3003_v40, %v3996_v21  ;;  %v3006_v14 = vadd.f32 %v3005_v46, %v3004_v38 }
 0x1e3   :  { %v3117_v49 = vpop.f32.mrb[111].mxu1 }
 0x1e4   :  { %v3118_v26 = vadd.f32 %v3117_v49, %v3116_v29  ;;  %v1610_v11 = vadd.f32 %v3006_v14, %v4004_v54  ;;  %v4105_v34 = vadd.f32 %v3115_v13, %v1607_v45 }
 0x1e6   :  { %v3007_v12 = vpop.f32.mrb[112].mxu0  ;;  %v4107_v16 = vadd.f32 %v3118_v26, %v1610_v11 }
 0x1e7   :  { %v3008_v53 = vpop.f32.mrb[113].mxu0 }
 0x1e8   :  { %v3119_v39 = vpop.f32.mrb[112].mxu1  ;;  %v3009_v7 = vadd.f32 %v3008_v53, %v3007_v12  ;;  %v3010_v15 = vpop.f32.mrb[114].mxu0 }
 0x1e9   :  { %v3120_v41 = vpop.f32.mrb[113].mxu1  ;;  %v3011_v28 = vpop.f32.mrb[115].mxu0 }
 0x1ea   :  { %v3121_v59 = vadd.f32 %v3120_v41, %v3119_v39  ;;  %v3122_v4 = vpop.f32.mrb[114].mxu1  ;;  %v1615_v21 = vadd.f32 %v3009_v7, %v4009_v1  ;;  %v3012_v42 = vadd.f32 %v3011_v28, %v3010_v15 }
 0x1eb   :  { %v3123_v35 = vpop.f32.mrb[115].mxu1 }
 0x1ec   :  { %v3124_v17 = vadd.f32 %v3123_v35, %v3122_v4  ;;  %v1618_v54 = vadd.f32 %v3012_v42, %v4011_v6  ;;  %v4111_v52 = vadd.f32 %v3121_v59, %v1615_v21 }
 0x1ee   :  { %v3013_v50 = vpop.f32.mrb[116].mxu0  ;;  %v4113_v62 = vadd.f32 %v3124_v17, %v1618_v54 }
 0x1ef   :  { %v3014_v13 = vpop.f32.mrb[117].mxu0 }
 0x1f0   :  { %v3125_v48 = vpop.f32.mrb[116].mxu1  ;;  %v3015_v30 = vadd.f32 %v3014_v13, %v3013_v50  ;;  %v3016_v49 = vpop.f32.mrb[118].mxu0 }
 0x1f1   :  { %v3126_v63 = vpop.f32.mrb[117].mxu1  ;;  %v3017_v38 = vpop.f32.mrb[119].mxu0 }
 0x1f2   :  { %v3127_v23 = vadd.f32 %v3126_v63, %v3125_v48  ;;  %v3128_v36 = vpop.f32.mrb[118].mxu1  ;;  %v1623_v1 = vadd.f32 %v3015_v30, %v4015_v51  ;;  %v3018_v26 = vadd.f32 %v3017_v38, %v3016_v49 }
 0x1f3   :  { %v3129_v29 = vpop.f32.mrb[119].mxu1 }
 0x1f4   :  { %v3130_v40 = vadd.f32 %v3129_v29, %v3128_v36  ;;  %v1626_v6 = vadd.f32 %v3018_v26, %v4020_v58  ;;  %v4117_v45 = vadd.f32 %v3127_v23, %v1623_v1 }
 0x1f6   :  { %v3019_v11 = vpop.f32.mrb[120].mxu0  ;;  %v4119_v12 = vadd.f32 %v3130_v40, %v1626_v6 }
 0x1f7   :  { %v3020_v59 = vpop.f32.mrb[121].mxu0 }
 0x1f8   :  { %v3131_v46 = vpop.f32.mrb[120].mxu1  ;;  %v3021_v53 = vadd.f32 %v3020_v59, %v3019_v11  ;;  %v3022_v35 = vpop.f32.mrb[122].mxu0 }
 0x1f9   :  { %v3132_v14 = vpop.f32.mrb[121].mxu1  ;;  %v3023_v15 = vpop.f32.mrb[123].mxu0 }
 0x1fa   :  { %v3133_v39 = vadd.f32 %v3132_v14, %v3131_v46  ;;  %v3134_v41 = vpop.f32.mrb[122].mxu1  ;;  %v1631_v51 = vadd.f32 %v3021_v53, %v4024_v56  ;;  %v3024_v17 = vadd.f32 %v3023_v15, %v3022_v35 }
 0x1fb   :  { %v3135_v4 = vpop.f32.mrb[123].mxu1 }
 0x1fc   :  { %v3136_v7 = vadd.f32 %v3135_v4, %v3134_v41  ;;  %v1634_v58 = vadd.f32 %v3024_v17, %v4026_v43  ;;  %v4123_v21 = vadd.f32 %v3133_v39, %v1631_v51 }
 0x1fe   :  { %v3025_v54 = vpop.f32.mrb[124].mxu0  ;;  %v4125_v50 = vadd.f32 %v3136_v7, %v1634_v58 }
 0x1ff   :  { %v3026_v23 = vpop.f32.mrb[125].mxu0 }
 0x200   :  { %v3137_v28 = vpop.f32.mrb[124].mxu1  ;;  %v3027_v13 = vadd.f32 %v3026_v23, %v3025_v54  ;;  %v3028_v29 = vpop.f32.mrb[126].mxu0 }
 0x201   :  { %v3138_v42 = vpop.f32.mrb[125].mxu1  ;;  %v3029_v49 = vpop.f32.mrb[127].mxu0 }
 0x202   :  { %v3139_v48 = vadd.f32 %v3138_v42, %v3137_v28  ;;  %v3140_v63 = vpop.f32.mrb[126].mxu1  ;;  %v1639_v56 = vadd.f32 %v3027_v13, %v4030_v37  ;;  %v3030_v40 = vadd.f32 %v3029_v49, %v3028_v29 }
 0x203   :  { %v3141_v36 = vpop.f32.mrb[127].mxu1 }
 0x204   :  { %v3142_v30 = vadd.f32 %v3141_v36, %v3140_v63  ;;  %v1642_v43 = vadd.f32 %v3030_v40, %v4035_v24  ;;  %v4129_v38 = vadd.f32 %v3139_v48, %v1639_v56 }
 0x206   :  { %v3209_v1 = vpop.f32.mrb[128].mxu0  ;;  %v4131_v26 = vadd.f32 %v3142_v30, %v1642_v43 }
 0x207   :  { %v1849_v6 = vadd.f32 %v3209_v1, %v4045_v9  ;;  %v1840_v46 = vpop.f32.mrb[129].mxu0 }
 0x208   :  { %v1841_v14 = vadd.f32 %v1840_v46, %v4039_v5  ;;  %v3210_v11 = vpop.f32.mrb[130].mxu0 }
 0x209   :  { %v1852_v39 = vadd.f32 %v3210_v11, %v4047_v61  ;;  %v1843_v41 = vpop.f32.mrb[131].mxu0  ;;  %v1969_v37 = vmax.f32 %v1849_v6, 0.0 }
 0x20a   :  { %v1844_v59 = vadd.f32 %v1843_v41, %v4041_v10  ;;  %v1967_v53 = vmax.f32 %v1841_v14, 0.0 }
 0x20b   :  { %v1970_v4 = vmax.f32 %v1852_v39, 0.0 }
 0x20c   :  { %v1968_v24 = vmax.f32 %v1844_v59, 0.0 }
 0x20d   :  { %v2000_v35 = vpack.c.bf16 %v1970_v4, %v1969_v37 }
 0x20e   :  { %v1999_v7 = vpack.c.bf16 %v1968_v24, %v1967_v53  ;;  %v3213_v15 = vpop.f32.mrb[132].mxu0 }
 0x20f   :  { %v1865_v51 = vadd.f32 %v3213_v15, %v4057_v31  ;;  %v1856_v17 = vpop.f32.mrb[133].mxu0 }
 0x210   :  { %v1857_v9 = vadd.f32 %v1856_v17, %v4051_v33  ;;  %v3214_v58 = vpop.f32.mrb[134].mxu0  ;;  %3255 = vmatprep.mubr.bf16.mxu1 %v1999_v7 }
 0x211   :  { %v1868_v5 = vadd.f32 %v3214_v58, %v4059_v22  ;;  %v1859_v61 = vpop.f32.mrb[135].mxu0  ;;  %3256 = vmatmul.mubr.bf16.vlgmr.msra.gmra.mrb[128].mxu1 %v2000_v35  ;;  %v1973_v28 = vmax.f32 %v1865_v51, 0.0 }
 0x212   :  { %v1860_v10 = vadd.f32 %v1859_v61, %v4053_v2  ;;  %v1971_v54 = vmax.f32 %v1857_v9, 0.0 }
 0x213   :  { %v1974_v42 = vmax.f32 %v1868_v5, 0.0 }
 0x214   :  { %v1972_v48 = vmax.f32 %v1860_v10, 0.0 }
 0x215   :  { %v2002_v63 = vpack.c.bf16 %v1974_v42, %v1973_v28 }
 0x216   :  { %v2001_v23 = vpack.c.bf16 %v1972_v48, %v1971_v54  ;;  %v3217_v36 = vpop.f32.mrb[136].mxu0 }
 0x217   :  { %v1881_v31 = vadd.f32 %v3217_v36, %v4069_v47  ;;  %v1872_v13 = vpop.f32.mrb[137].mxu0 }
 0x218   :  { %v1873_v33 = vadd.f32 %v1872_v13, %v4063_v0  ;;  %v3218_v29 = vpop.f32.mrb[138].mxu0  ;;  %3259 = vmatprep.mubr.bf16.mxu1 %v2001_v23 }
 0x219   :  { %v1884_v22 = vadd.f32 %v3218_v29, %v4071_v60  ;;  %v1875_v30 = vpop.f32.mrb[139].mxu0  ;;  %3260 = vmatmul.mubr.bf16.gmra.mrb[132].mxu1 %v2002_v63  ;;  %v1977_v49 = vmax.f32 %v1881_v31, 0.0 }
 0x21a   :  { %v1876_v2 = vadd.f32 %v1875_v30, %v4065_v44  ;;  %v1975_v40 = vmax.f32 %v1873_v33, 0.0 }
 0x21b   :  { %v1978_v56 = vmax.f32 %v1884_v22, 0.0 }
 0x21c   :  { %v1976_v43 = vmax.f32 %v1876_v2, 0.0 }
 0x21d   :  { %v2004_v1 = vpack.c.bf16 %v1978_v56, %v1977_v49 }
 0x21e   :  { %v2003_v6 = vpack.c.bf16 %v1976_v43, %v1975_v40  ;;  %v3221_v46 = vpop.f32.mrb[140].mxu0 }
 0x21f   :  { %v1897_v47 = vadd.f32 %v3221_v46, %v4081_v19  ;;  %v1888_v14 = vpop.f32.mrb[141].mxu0 }
 0x220   :  { %v1889_v0 = vadd.f32 %v1888_v14, %v4075_v18  ;;  %v3222_v11 = vpop.f32.mrb[142].mxu0  ;;  %3263 = vmatprep.mubr.bf16.mxu1 %v2003_v6 }
 0x221   :  { %v1900_v60 = vadd.f32 %v3222_v11, %v4083_v57  ;;  %v1891_v39 = vpop.f32.mrb[143].mxu0  ;;  %3264 = vmatmul.mubr.bf16.gmra.mrb[136].mxu1 %v2004_v1  ;;  %v1981_v41 = vmax.f32 %v1897_v47, 0.0 }
 0x222   :  { %v1892_v44 = vadd.f32 %v1891_v39, %v4077_v3  ;;  %v1979_v37 = vmax.f32 %v1889_v0, 0.0 }
 0x223   :  { %v1982_v59 = vmax.f32 %v1900_v60, 0.0 }
 0x224   :  { %v1980_v4 = vmax.f32 %v1892_v44, 0.0 }
 0x225   :  { %v2006_v53 = vpack.c.bf16 %v1982_v59, %v1981_v41 }
 0x226   :  { %v2005_v24 = vpack.c.bf16 %v1980_v4, %v1979_v37  ;;  %v3225_v35 = vpop.f32.mrb[144].mxu0 }
 0x227   :  { %v1913_v19 = vadd.f32 %v3225_v35, %v4093_v25  ;;  %v1904_v7 = vpop.f32.mrb[145].mxu0 }
 0x228   :  { %v1905_v18 = vadd.f32 %v1904_v7, %v4087_v20  ;;  %v3226_v15 = vpop.f32.mrb[146].mxu0  ;;  %3267 = vmatprep.mubr.bf16.mxu1 %v2005_v24 }
 0x229   :  { %v1916_v57 = vadd.f32 %v3226_v15, %v4095_v55  ;;  %v1907_v51 = vpop.f32.mrb[147].mxu0  ;;  %3268 = vmatmul.mubr.bf16.gmra.mrb[140].mxu1 %v2006_v53  ;;  %v1985_v17 = vmax.f32 %v1913_v19, 0.0 }
 0x22a   :  { %v1908_v3 = vadd.f32 %v1907_v51, %v4089_v8  ;;  %v1983_v58 = vmax.f32 %v1905_v18, 0.0 }
 0x22b   :  { %v1986_v9 = vmax.f32 %v1916_v57, 0.0 }
 0x22c   :  { %v1984_v5 = vmax.f32 %v1908_v3, 0.0 }
 0x22d   :  { %v2008_v61 = vpack.c.bf16 %v1986_v9, %v1985_v17 }
 0x22e   :  { %v2007_v10 = vpack.c.bf16 %v1984_v5, %v1983_v58  ;;  %v3229_v28 = vpop.f32.mrb[148].mxu0 }
 0x22f   :  { %v1929_v25 = vadd.f32 %v3229_v28, %v4105_v34  ;;  %v1920_v42 = vpop.f32.mrb[149].mxu0 }
 0x230   :  { %v1921_v20 = vadd.f32 %v1920_v42, %v4099_v27  ;;  %v3230_v54 = vpop.f32.mrb[150].mxu0  ;;  %3271 = vmatprep.mubr.bf16.mxu1 %v2007_v10 }
 0x231   :  { %v1932_v55 = vadd.f32 %v3230_v54, %v4107_v16  ;;  %v1923_v48 = vpop.f32.mrb[151].mxu0  ;;  %3272 = vmatmul.mubr.bf16.gmra.mrb[144].mxu1 %v2008_v61  ;;  %v1989_v63 = vmax.f32 %v1929_v25, 0.0 }
 0x232   :  { %v1924_v8 = vadd.f32 %v1923_v48, %v4101_v32  ;;  %v1987_v36 = vmax.f32 %v1921_v20, 0.0 }
 0x233   :  { %v1990_v23 = vmax.f32 %v1932_v55, 0.0 }
 0x234   :  { %v1988_v31 = vmax.f32 %v1924_v8, 0.0 }
 0x235   :  { %v2010_v13 = vpack.c.bf16 %v1990_v23, %v1989_v63 }
 0x236   :  { %v2009_v33 = vpack.c.bf16 %v1988_v31, %v1987_v36  ;;  %v3233_v29 = vpop.f32.mrb[152].mxu0 }
 0x237   :  { %v1945_v34 = vadd.f32 %v3233_v29, %v4117_v45  ;;  %v1936_v22 = vpop.f32.mrb[153].mxu0 }
 0x238   :  { %v1937_v27 = vadd.f32 %v1936_v22, %v4111_v52  ;;  %v3234_v30 = vpop.f32.mrb[154].mxu0  ;;  %3275 = vmatprep.mubr.bf16.mxu1 %v2009_v33 }
 0x239   :  { %v1948_v16 = vadd.f32 %v3234_v30, %v4119_v12  ;;  %v1939_v2 = vpop.f32.mrb[155].mxu0  ;;  %3276 = vmatmul.mubr.bf16.gmra.mrb[148].mxu1 %v2010_v13  ;;  %v1993_v49 = vmax.f32 %v1945_v34, 0.0 }
 0x23a   :  { %v1940_v32 = vadd.f32 %v1939_v2, %v4113_v62  ;;  %v1991_v40 = vmax.f32 %v1937_v27, 0.0 }
 0x23b   :  { %v1994_v56 = vmax.f32 %v1948_v16, 0.0 }
 0x23c   :  { %v1992_v43 = vmax.f32 %v1940_v32, 0.0 }
 0x23d   :  { %v2012_v1 = vpack.c.bf16 %v1994_v56, %v1993_v49 }
 0x23e   :  { %v2011_v6 = vpack.c.bf16 %v1992_v43, %v1991_v40  ;;  %v3237_v46 = vpop.f32.mrb[156].mxu0 }
 0x23f   :  { %v1961_v45 = vadd.f32 %v3237_v46, %v4129_v38  ;;  %v1952_v47 = vpop.f32.mrb[157].mxu0 }
 0x240   :  { %v1953_v52 = vadd.f32 %v1952_v47, %v4123_v21  ;;  %v3238_v14 = vpop.f32.mrb[158].mxu0  ;;  %3279 = vmatprep.mubr.bf16.mxu1 %v2011_v6  ;;  %v4168_v21 = vld [vmem:[%s4254_s4] ss:$0 sm:$0xff] }
 0x241   :  { %v1964_v12 = vadd.f32 %v3238_v14, %v4131_v26  ;;  %v1955_v0 = vpop.f32.mrb[159].mxu0  ;;  %3280 = vmatmul.mubr.bf16.gmra.mrb[152].mxu1 %v2012_v1  ;;  %v1997_v11 = vmax.f32 %v1961_v45, 0.0 }
 0x242   :  { %v1956_v62 = vadd.f32 %v1955_v0, %v4125_v50  ;;  %v1995_v39 = vmax.f32 %v1953_v52, 0.0 }
 0x243   :  { %v1998_v60 = vmax.f32 %v1964_v12, 0.0 }
 0x244   :  { %v1996_v44 = vmax.f32 %v1956_v62, 0.0 }
 0x245   :  { %v2014_v41 = vpack.c.bf16 %v1998_v60, %v1997_v11 }
 0x246   :  { %v2013_v59 = vpack.c.bf16 %v1996_v44, %v1995_v39 }
 0x248   :  { %3283 = vmatprep.mubr.bf16.mxu1 %v2013_v59 }
 0x249   :  { %3284 = vmatmul.mubr.bf16.gmra.mrb[156].mxu1 %v2014_v41 }
 0x2e4   :  { %v3257_v38 = vpop.f32.mrb[128].mxu1 }
 0x2e5   :  { %v2120_v37 = vpop.f32.mrb[129].mxu1  ;;  %v2129_v4 = vadd.f32 %v3257_v38, %v4168_v21 }
 0x2e6   :  { %v3258_v26 = vpop.f32.mrb[130].mxu1  ;;  %v2121_v24 = vadd.f32 %v4168_v21, %v2120_v37 }
 0x2e7   :  { %v2132_v50 = vadd.f32 %v3258_v26, %v4168_v21  ;;  %v2123_v53 = vpop.f32.mrb[131].mxu1 }
 0x2e8   :  { %v2124_v35 = vadd.f32 %v4168_v21, %v2123_v53 }
 0x2e9   :  { %v2608_v19 = vpack.c.bf16 %v2132_v50, %v2129_v4 }
 0x2ea   :  { %v2603_v7 = vpack.c.bf16 %v2124_v35, %v2121_v24 }
 0x2eb   :  { %2680 = vst [vmem:[%s4255_s5 + $0x8] sm:$0xff] %v2608_v19  }
 0x2ec   :  { %2604 = vst [vmem:[%s4255_s5] sm:$0xff] %v2603_v7   ;;  %v3261_v18 = vpop.f32.mrb[132].mxu1 }
 0x2ed   :  { %v2136_v15 = vpop.f32.mrb[133].mxu1  ;;  %v2145_v51 = vadd.f32 %v3261_v18, %v4168_v21 }
 0x2ee   :  { %v3262_v57 = vpop.f32.mrb[134].mxu1  ;;  %v2137_v9 = vadd.f32 %v4168_v21, %v2136_v15 }
 0x2ef   :  { %v2148_v3 = vadd.f32 %v3262_v57, %v4168_v21  ;;  %v2139_v17 = vpop.f32.mrb[135].mxu1 }
 0x2f0   :  { %v2140_v58 = vadd.f32 %v4168_v21, %v2139_v17 }
 0x2f1   :  { %v2618_v5 = vpack.c.bf16 %v2148_v3, %v2145_v51 }
 0x2f2   :  { %v2613_v61 = vpack.c.bf16 %v2140_v58, %v2137_v9 }
 0x2f3   :  { %2682 = vst [vmem:[%s4255_s5 + $0x18] sm:$0xff] %v2618_v5  }
 0x2f4   :  { %2681 = vst [vmem:[%s4255_s5 + $0x10] sm:$0xff] %v2613_v61   ;;  %v3265_v10 = vpop.f32.mrb[136].mxu1 }
 0x2f5   :  { %v2152_v28 = vpop.f32.mrb[137].mxu1  ;;  %v2161_v42 = vadd.f32 %v3265_v10, %v4168_v21 }
 0x2f6   :  { %v3266_v25 = vpop.f32.mrb[138].mxu1  ;;  %v2153_v55 = vadd.f32 %v4168_v21, %v2152_v28 }
 0x2f7   :  { %v2164_v20 = vadd.f32 %v3266_v25, %v4168_v21  ;;  %v2155_v54 = vpop.f32.mrb[139].mxu1 }
 0x2f8   :  { %v2156_v48 = vadd.f32 %v4168_v21, %v2155_v54 }
 0x2f9   :  { %v2628_v8 = vpack.c.bf16 %v2164_v20, %v2161_v42 }
 0x2fa   :  { %v2623_v63 = vpack.c.bf16 %v2156_v48, %v2153_v55 }
 0x2fb   :  { %2684 = vst [vmem:[%s4255_s5 + $0x28] sm:$0xff] %v2628_v8  }
 0x2fc   :  { %2683 = vst [vmem:[%s4255_s5 + $0x20] sm:$0xff] %v2623_v63   ;;  %v3269_v23 = vpop.f32.mrb[140].mxu1 }
 0x2fd   :  { %v2168_v36 = vpop.f32.mrb[141].mxu1  ;;  %v2177_v13 = vadd.f32 %v3269_v23, %v4168_v21 }
 0x2fe   :  { %v3270_v31 = vpop.f32.mrb[142].mxu1  ;;  %v2169_v34 = vadd.f32 %v4168_v21, %v2168_v36 }
 0x2ff   :  { %v2180_v33 = vadd.f32 %v3270_v31, %v4168_v21  ;;  %v2171_v29 = vpop.f32.mrb[143].mxu1 }
 0x300   :  { %v2172_v22 = vadd.f32 %v4168_v21, %v2171_v29 }
 0x301   :  { %v2638_v27 = vpack.c.bf16 %v2180_v33, %v2177_v13 }
 0x302   :  { %v2633_v30 = vpack.c.bf16 %v2172_v22, %v2169_v34 }
 0x303   :  { %2686 = vst [vmem:[%s4255_s5 + $0x38] sm:$0xff] %v2638_v27  }
 0x304   :  { %2685 = vst [vmem:[%s4255_s5 + $0x30] sm:$0xff] %v2633_v30   ;;  %v3273_v16 = vpop.f32.mrb[144].mxu1 }
 0x305   :  { %v2184_v2 = vpop.f32.mrb[145].mxu1  ;;  %v2193_v49 = vadd.f32 %v3273_v16, %v4168_v21 }
 0x306   :  { %v3274_v32 = vpop.f32.mrb[146].mxu1  ;;  %v2185_v43 = vadd.f32 %v4168_v21, %v2184_v2 }
 0x307   :  { %v2196_v56 = vadd.f32 %v3274_v32, %v4168_v21  ;;  %v2187_v40 = vpop.f32.mrb[147].mxu1 }
 0x308   :  { %v2188_v1 = vadd.f32 %v4168_v21, %v2187_v40 }
 0x309   :  { %v2648_v6 = vpack.c.bf16 %v2196_v56, %v2193_v49 }
 0x30a   :  { %v2643_v46 = vpack.c.bf16 %v2188_v1, %v2185_v43 }
 0x30b   :  { %2688 = vst [vmem:[%s4255_s5 + $0x48] sm:$0xff] %v2648_v6  }
 0x30c   :  { %2687 = vst [vmem:[%s4255_s5 + $0x40] sm:$0xff] %v2643_v46   ;;  %v3277_v45 = vpop.f32.mrb[148].mxu1 }
 0x30d   :  { %v2200_v47 = vpop.f32.mrb[149].mxu1  ;;  %v2209_v14 = vadd.f32 %v3277_v45, %v4168_v21 }
 0x30e   :  { %v3278_v52 = vpop.f32.mrb[150].mxu1  ;;  %v2201_v62 = vadd.f32 %v4168_v21, %v2200_v47 }
 0x30f   :  { %v2212_v12 = vadd.f32 %v3278_v52, %v4168_v21  ;;  %v2203_v0 = vpop.f32.mrb[151].mxu1 }
 0x310   :  { %v2204_v11 = vadd.f32 %v4168_v21, %v2203_v0 }
 0x311   :  { %v2658_v60 = vpack.c.bf16 %v2212_v12, %v2209_v14 }
 0x312   :  { %v2653_v39 = vpack.c.bf16 %v2204_v11, %v2201_v62 }
 0x313   :  { %2690 = vst [vmem:[%s4255_s5 + $0x58] sm:$0xff] %v2658_v60  }
 0x314   :  { %2689 = vst [vmem:[%s4255_s5 + $0x50] sm:$0xff] %v2653_v39   ;;  %v3281_v44 = vpop.f32.mrb[152].mxu1 }
 0x315   :  { %v2216_v41 = vpop.f32.mrb[153].mxu1  ;;  %v2225_v38 = vadd.f32 %v3281_v44, %v4168_v21 }
 0x316   :  { %v3282_v59 = vpop.f32.mrb[154].mxu1  ;;  %v2217_v4 = vadd.f32 %v4168_v21, %v2216_v41 }
 0x317   :  { %v2228_v37 = vadd.f32 %v3282_v59, %v4168_v21  ;;  %v2219_v26 = vpop.f32.mrb[155].mxu1 }
 0x318   :  { %v2220_v50 = vadd.f32 %v4168_v21, %v2219_v26 }
 0x319   :  { %v2668_v53 = vpack.c.bf16 %v2228_v37, %v2225_v38 }
 0x31a   :  { %v2663_v24 = vpack.c.bf16 %v2220_v50, %v2217_v4 }
 0x31b   :  { %2692 = vst [vmem:[%s4255_s5 + $0x68] sm:$0xff] %v2668_v53  }
 0x31c   :  { %2691 = vst [vmem:[%s4255_s5 + $0x60] sm:$0xff] %v2663_v24   ;;  %v3285_v35 = vpop.f32.mrb[156].mxu1 }
 0x31d   :  { %v2232_v19 = vpop.f32.mrb[157].mxu1  ;;  %v2241_v18 = vadd.f32 %v3285_v35, %v4168_v21 }
 0x31e   :  { %v3286_v7 = vpop.f32.mrb[158].mxu1  ;;  %v2233_v51 = vadd.f32 %v4168_v21, %v2232_v19 }
 0x31f   :  { %v2244_v15 = vadd.f32 %v3286_v7, %v4168_v21  ;;  %v2235_v57 = vpop.f32.mrb[159].mxu1 }
 0x320   :  { %v2236_v3 = vadd.f32 %v4168_v21, %v2235_v57 }
 0x321   :  { %v2678_v17 = vpack.c.bf16 %v2244_v15, %v2241_v18 }
 0x322   :  { %v2673_v9 = vpack.c.bf16 %v2236_v3, %v2233_v51 }
 0x323   :  { %2694 = vst [vmem:[%s4255_s5 + $0x78] sm:$0xff] %v2678_v17  }
 0x324   :  { %2693 = vst [vmem:[%s4255_s5 + $0x70] sm:$0xff] %v2673_v9  }
 0x325   :  { %2411 = vsyncpa [#allocation3], 1 }

// kernel: _lambda_.3
= control target key start
LH: loop header
LB: loop body
LE: loop exit
PB: predicated region body
PF: predicated region fallthrough
CT: control target
= control target key end

     0   :  { %v309_v0 = vlaneseq  ;;  %vm678_vm0 = vcmask 1040384   ;;  %vm697_vm1 = vcmask 1041408   ;;  %vm716_vm2 = vcmask 1042432   ;;  %s1241_s0 = inlined_call_operand.vmem [shape: bf16[4,2304], index: 0, kind: input, shape index: {}]   ;;  %s1242_s1 = inlined_call_operand.vmem [shape: f32[4,2304], index: 1, kind: input, shape index: {}]   ;;  %s1243_s3 = inlined_call_operand.vmem [shape: f32[4,2304], index: 3, kind: output, shape index: {0}]   ;;  %s1244_s2 = inlined_call_operand.vmem [shape: bf16[1,2304], index: 2, kind: input, shape index: {}]   ;;  %s1245_s4 = inlined_call_operand.vmem [shape: f32[1,2304], index: 4, kind: output, shape index: {1}]  }
   0x1   :  { %v16_v1 = vld [vmem:[%s1242_s1] sm:$0xff]  ;;  %v17_v3 = vld [vmem:[%s1242_s1 + $0x8] sm:$0xff]  ;;  %v18_v8 = vld [vmem:[%s1242_s1 + $0x10] sm:$0xff] }
   0x2   :  { %v25_v2 = vld [vmem:[%s1241_s0] sm:$0xff]  ;;  %v57_v5 = vrot.slane %v16_v1, 6  ;;  %v967_v6 = vshrl.u32 %v309_v0, 7  ;;  %v26_v9 = vld [vmem:[%s1241_s0 + $0x8] sm:$0xff]  ;;  %v58_v10 = vrot.slane %v17_v3, 6  ;;  %v59_v12 = vrot.slane %v18_v8, 6 }
   0x3   :  { %v30_v4 = vunpack.c.l.bf16 %v25_v2  ;;  %v31_v7 = vunpack.c.h.bf16 %v25_v2  ;;  %v32_v11 = vunpack.c.l.bf16 %v26_v9  ;;  %v33_v16 = vunpack.c.h.bf16 %v26_v9  ;;  %v19_v32 = vld [vmem:[%s1242_s1 + $0x18] sm:$0xff]  ;;  %v27_v36 = vld [vmem:[%s1241_s0 + $0x10] sm:$0xff]  ;;  %v20_v41 = vld [vmem:[%s1242_s1 + $0x20] sm:$0xff] }
   0x4   :  { %v975_v14 = vsub.f32 %v16_v1, %v57_v5  ;;  %v978_v17 = vsub.s32 2, %v967_v6  ;;  %v981_v18 = vsub.s32 6, %v967_v6  ;;  %v984_v19 = vsub.s32 3, %v967_v6  ;;  %v21_v56 = vld [vmem:[%s1242_s1 + $0x28] sm:$0xff] }
   0x5   :  { %v39_v13 = vmin.f32 %v30_v4, 4.1351666  ;;  %v147_v15 = vrot.slane %v30_v4, 6  ;;  %v40_v20 = vmin.f32 %v31_v7, 4.1351666  ;;  %v988_v23 = vsub.s32 7, %v967_v6 }
   0x6   :  { %v84_v21 = vmul.f32 0.5, %v975_v14  ;;  %v76_v24 = vsub.f32 %v17_v3, %v58_v10  ;;  %v148_v25 = vrot.slane %v31_v7, 6  ;;  %v41_v27 = vmin.f32 %v32_v11, 4.1351666  ;;  %v1013_v7 = vld [vmem:[%s1241_s0 + $0x18] sm:$0xff] }
   0x7   :  { %v210_v22 = vmul.f32 1.442695, %v39_v13  ;;  %v212_v26 = vmul.f32 1.442695, %v40_v20  ;;  %v990_v28 = vsub.f32 %v18_v8, %v59_v12  ;;  %v165_v30 = vmul.f32 %v147_v15, %v975_v14 }
   0x8   :  { %v878_v29 = vrot.slane %v84_v21, 10  ;;  %v85_v31 = vmul.f32 0.5, %v76_v24  ;;  %v149_v34 = vrot.slane %v32_v11, 6  ;;  %v214_v35 = vmul.f32 1.442695, %v41_v27  ;;  %v1021_v21 = vld [vmem:[%s1242_s1 + $0x30] sm:$0xff] }
   0x9   :  { %893 = vpow2.f32 %v210_v22  ;;  %v86_v33 = vmul.f32 0.5, %v990_v28  ;;  %v166_v39 = vmul.f32 %v148_v25, %v76_v24  ;;  %v42_v40 = vmin.f32 %v33_v16, 4.1351666 }
   0xa   :  { %895 = vpow2.f32 %v212_v26  ;;  %v129_v37 = vadd.f32 %v878_v29, %v16_v1  ;;  %v879_v38 = vrot.slane %v85_v31, 10  ;;  %v60_v43 = vrot.slane %v19_v32, 6 }
   0xb   :  { %v880_v42 = vrot.slane %v86_v33, 10  ;;  %897 = vpow2.f32 %v214_v35  ;;  %v150_v44 = vrot.slane %v33_v16, 6  ;;  %v216_v47 = vmul.f32 1.442695, %v42_v40 }
   0xc   :  { %v183_v45 = vrot.slane %v129_v37, 6  ;;  %v130_v46 = vadd.f32 %v879_v38, %v17_v3  ;;  %v34_v48 = vunpack.c.l.bf16 %v27_v36  ;;  %v78_v50 = vsub.f32 %v19_v32, %v60_v43 }
   0xd   :  { %v131_v49 = vadd.f32 %v880_v42, %v18_v8  ;;  %v61_v51 = vrot.slane %v20_v41, 6  ;;  %v35_v52 = vunpack.c.h.bf16 %v27_v36  ;;  %v167_v54 = vmul.f32 %v149_v34, %v990_v28 }
   0xe   :  { %v184_v53 = vrot.slane %v130_v46, 6  ;;  %899 = vpow2.f32 %v216_v47  ;;  %v43_v55 = vmin.f32 %v34_v48, 4.1351666  ;;  %v201_v57 = vadd.f32 %v183_v45, %v165_v30 }
   0xf   :  { %v185_v58 = vrot.slane %v131_v49, 6  ;;  %v87_v59 = vmul.f32 0.5, %v78_v50  ;;  %v1007_v60 = vsub.f32 %v20_v41, %v61_v51  ;;  %v168_v61 = vmul.f32 %v150_v44, %v78_v50 }
  0x10   :  { %v151_v62 = vrot.slane %v34_v48, 6  ;;  %v218_v63 = vmul.f32 1.442695, %v43_v55  ;;  %v44_v1 = vmin.f32 %v35_v52, 4.1351666  ;;  %v202_v2 = vadd.f32 %v184_v53, %v166_v39 }
  0x11   :  { %v881_v3 = vrot.slane %v87_v59, 10  ;;  %v88_v4 = vmul.f32 0.5, %v1007_v60  ;;  %v62_v5 = vrot.slane %v21_v56, 6  ;;  %v203_v9 = vadd.f32 %v185_v58, %v167_v54 }
  0x12   :  { %901 = vpow2.f32 %v218_v63  ;;  %v152_v10 = vrot.slane %v35_v52, 6  ;;  %v220_v11 = vmul.f32 1.442695, %v44_v1  ;;  %v169_v25 = vmul.f32 %v151_v62, %v1007_v60 }
  0x13   :  { %v894_v8 = vpop.eup %893  ;;  %v132_v15 = vadd.f32 %v881_v3, %v19_v32  ;;  %v882_v16 = vrot.slane %v88_v4, 10  ;;  %v1016_v20 = vsub.f32 %v21_v56, %v62_v5  ;;  %v36_v26 = vunpack.c.l.bf16 %v1013_v7 }
  0x14   :  { %v896_v12 = vpop.eup %895  ;;  %v228_v13 = vmul.f32 %v894_v8, %v975_v14  ;;  %903 = vpow2.f32 %v220_v11  ;;  %vm867_vm3 = vcmp.lt.s32.totalorder %v309_v0, 256 }
  0x15   :  { %v229_v22 = vmul.f32 %v896_v12, %v76_v24  ;;  %v898_v27 = vpop.eup %897  ;;  %v186_v14 = vrot.slane %v132_v15, 6  ;;  %v133_v30 = vadd.f32 %v882_v16, %v20_v41  ;;  %v89_v31 = vmul.f32 0.5, %v1016_v20 }
  0x16   :  { %v237_v29 = vmul.f32 0.5, %v228_v13  ;;  %v230_v33 = vmul.f32 %v898_v27, %v990_v28  ;;  %v1028_v34 = vmul.f32 %v152_v10, %v1016_v20  ;;  %v63_v24 = vrot.slane %v1021_v21, 6 }
  0x17   :  { %v238_v32 = vmul.f32 0.5, %v229_v22  ;;  %v1031_v37 = vadd.f32 %v186_v14, %v168_v61  ;;  %v187_v38 = vrot.slane %v133_v30, 6  ;;  %v883_v43 = vrot.slane %v89_v31, 10 }
  0x18   :  { %v246_v35 = vsub.f32 %v201_v57, %v237_v29  ;;  %v273_v36 = vadd.f32 %v237_v29, %v201_v57  ;;  %v900_v39 = vpop.eup %899  ;;  %v239_v41 = vmul.f32 0.5, %v230_v33 }
  0x19   :  { %v247_v40 = vsub.f32 %v202_v2, %v238_v32  ;;  %v274_v42 = vadd.f32 %v238_v32, %v202_v2  ;;  %v231_v46 = vmul.f32 %v900_v39, %v78_v50  ;;  %v1033_v47 = vadd.f32 %v187_v38, %v169_v25 }
  0x1a   :  { %v255_v44 = vmax.f32 %v246_v35, 0.0  ;;  %v282_v45 = vmax.f32 %v273_v36, 0.0  ;;  %v248_v49 = vsub.f32 %v203_v9, %v239_v41  ;;  %v275_v51 = vadd.f32 %v239_v41, %v203_v9 }
  0x1b   :  { %v256_v28 = vmax.f32 %v247_v40, 0.0  ;;  %v283_v48 = vmax.f32 %v274_v42, 0.0  ;;  %v240_v54 = vmul.f32 0.5, %v231_v46  ;;  %v1035_v55 = vadd.f32 %v883_v43, %v21_v56 }
  0x1c   :  { %v264_v52 = vmin.f32 %v255_v44, 128.0  ;;  %v291_v53 = vmin.f32 %v282_v45, 128.0  ;;  %v902_v57 = vpop.eup %901  ;;  %v257_v61 = vmax.f32 %v248_v49, 0.0  ;;  %v284_v62 = vmax.f32 %v275_v51, 0.0 }
  0x1d   :  { %v265_v58 = vmin.f32 %v256_v28, 128.0  ;;  %v292_v59 = vmin.f32 %v283_v48, 128.0  ;;  %v249_v41 = vsub.f32 %v1031_v37, %v240_v54  ;;  %v276_v43 = vadd.f32 %v240_v54, %v1031_v37 }
  0x1e   :  { %v312_v63 = vrot.slane %v264_v52, %v978_v17  ;;  %v316_v50 = vrot.slane %v264_v52, %v981_v18  ;;  %v402_v1 = vrot.slane %v264_v52, %v984_v19  ;;  %v406_v2 = vrot.slane %v264_v52, %v988_v23  ;;  %v904_v3 = vpop.eup %903 }
  0x1f   :  { %v501_v4 = vrot.slane %v291_v53, %v978_v17  ;;  %v505_v5 = vrot.slane %v291_v53, %v981_v18  ;;  %v591_v56 = vrot.slane %v291_v53, %v984_v19  ;;  %v595_v8 = vrot.slane %v291_v53, %v988_v23 }
  0x20   :  { %v679_v9 = vsel %vm678_vm0, %v312_v63, %v402_v1  ;;  %v680_v10 = vsel %vm678_vm0, %v316_v50, %v406_v2  ;;  %v320_v11 = vrot.slane %v265_v58, %v978_v17  ;;  %v324_v12 = vrot.slane %v265_v58, %v981_v18 }
  0x21   :  { %v698_v13 = vsel %vm697_vm1, %v679_v9, %v501_v4  ;;  %v699_v15 = vsel %vm697_vm1, %v680_v10, %v505_v5  ;;  %v410_v16 = vrot.slane %v265_v58, %v984_v19  ;;  %v414_v22 = vrot.slane %v265_v58, %v988_v23 }
  0x22   :  { %v717_v25 = vsel %vm716_vm2, %v698_v13, %v591_v56  ;;  %v718_v27 = vsel %vm716_vm2, %v699_v15, %v595_v8  ;;  %v509_v29 = vrot.slane %v292_v59, %v978_v17  ;;  %v513_v14 = vrot.slane %v292_v59, %v981_v18 }
  0x23   :  { %v753_v30 = vcombine.low %v717_v25, %v718_v27  ;;  %v599_v31 = vrot.slane %v292_v59, %v984_v19  ;;  %v603_v32 = vrot.slane %v292_v59, %v988_v23  ;;  %v681_v33 = vsel %vm678_vm0, %v320_v11, %v410_v16 }
  0x24   :  { %v682_v35 = vsel %vm678_vm0, %v324_v12, %v414_v22  ;;  %v700_v36 = vsel %vm697_vm1, %v681_v33, %v509_v29  ;;  %v266_v38 = vmin.f32 %v257_v61, 128.0  ;;  %v293_v39 = vmin.f32 %v284_v62, 128.0 }
  0x25   :  { %771 = vst [vmem:[%s1243_s3] sm:$0xff] %v753_v30  ;;  %v701_v40 = vsel %vm697_vm1, %v682_v35, %v513_v14  ;;  %v719_v42 = vsel %vm716_vm2, %v700_v36, %v599_v31  ;;  %v258_v54 = vmax.f32 %v249_v41, 0.0  ;;  %v285_v62 = vmax.f32 %v276_v43, 0.0 }
  0x26   :  { %v720_v44 = vsel %vm716_vm2, %v701_v40, %v603_v32  ;;  %v328_v45 = vrot.slane %v266_v38, %v978_v17  ;;  %v332_v46 = vrot.slane %v266_v38, %v981_v18  ;;  %v418_v28 = vrot.slane %v266_v38, %v984_v19 }
  0x27   :  { %v754_v48 = vcombine.low %v719_v42, %v720_v44  ;;  %v422_v49 = vrot.slane %v266_v38, %v988_v23  ;;  %v517_v51 = vrot.slane %v293_v39, %v978_v17  ;;  %v521_v52 = vrot.slane %v293_v39, %v981_v18 }
  0x28   :  { %v607_v53 = vrot.slane %v293_v39, %v984_v19  ;;  %v611_v58 = vrot.slane %v293_v39, %v988_v23  ;;  %v683_v37 = vsel %vm678_vm0, %v328_v45, %v418_v28  ;;  %v232_v63 = vmul.f32 %v902_v57, %v1007_v60 }
  0x29   :  { %772 = vst [vmem:[%s1243_s3 + $0x8] sm:$0xff] %v754_v48  ;;  %v684_v59 = vsel %vm678_vm0, %v332_v46, %v422_v49  ;;  %v702_v61 = vsel %vm697_vm1, %v683_v37, %v517_v51  ;;  %v267_v2 = vmin.f32 %v258_v54, 128.0  ;;  %v188_v4 = vrot.slane %v1035_v55, 6 }
  0x2a   :  { %v703_v50 = vsel %vm697_vm1, %v684_v59, %v521_v52  ;;  %v721_v1 = vsel %vm716_vm2, %v702_v61, %v607_v53  ;;  %v294_v56 = vmin.f32 %v285_v62, 128.0  ;;  %v241_v8 = vmul.f32 0.5, %v232_v63 }
  0x2b   :  { %v722_v5 = vsel %vm716_vm2, %v703_v50, %v611_v58  ;;  %v233_v9 = vmul.f32 %v904_v3, %v1016_v20  ;;  %v336_v11 = vrot.slane %v267_v2, %v978_v17  ;;  %v340_v12 = vrot.slane %v267_v2, %v981_v18 }
  0x2c   :  { %v755_v10 = vcombine.low %v721_v1, %v722_v5  ;;  %v426_v60 = vrot.slane %v267_v2, %v984_v19  ;;  %v430_v57 = vrot.slane %v267_v2, %v988_v23  ;;  %v525_v13 = vrot.slane %v294_v56, %v978_v17 }
  0x2d   :  { %v529_v15 = vrot.slane %v294_v56, %v981_v18  ;;  %v615_v55 = vrot.slane %v294_v56, %v984_v19  ;;  %v619_v20 = vrot.slane %v294_v56, %v988_v23  ;;  %v250_v16 = vsub.f32 %v1033_v47, %v241_v8 }
  0x2e   :  { %773 = vst [vmem:[%s1243_s3 + $0x10] sm:$0xff] %v755_v10  ;;  %v685_v3 = vsel %vm678_vm0, %v336_v11, %v426_v60  ;;  %v277_v22 = vadd.f32 %v241_v8, %v1033_v47  ;;  %v686_v25 = vsel %vm678_vm0, %v340_v12, %v430_v57  ;;  %v206_v29 = vadd.f32 %v188_v4, %v1028_v34  ;;  %v23_v10 = vld [vmem:[%s1242_s1 + $0x38] sm:$0xff] }
  0x2f   :  { %v704_v27 = vsel %vm697_vm1, %v685_v3, %v525_v13  ;;  %v242_v14 = vmul.f32 0.5, %v233_v9  ;;  %v705_v30 = vsel %vm697_vm1, %v686_v25, %v529_v15  ;;  %v259_v32 = vmax.f32 %v250_v16, 0.0  ;;  %v24_v25 = vld [vmem:[%s1242_s1 + $0x40] sm:$0xff] }
  0x30   :  { %v723_v31 = vsel %vm716_vm2, %v704_v27, %v615_v55  ;;  %v286_v33 = vmax.f32 %v277_v22, 0.0  ;;  %v724_v35 = vsel %vm716_vm2, %v705_v30, %v619_v20  ;;  %v1113_v47 = vsub.f32 %v1021_v21, %v63_v24  ;;  %v29_v55 = vld [vmem:[%s1241_s0 + $0x20] sm:$0xf] }
  0x31   :  { %v251_v36 = vsub.f32 %v206_v29, %v242_v14  ;;  %v278_v38 = vadd.f32 %v242_v14, %v206_v29  ;;  %v756_v39 = vcombine.low %v723_v31, %v724_v35  ;;  %v268_v40 = vmin.f32 %v259_v32, 128.0  ;;  %v780_v27 = vld [vmem:[%s1244_s2] sm:$0xff] }
  0x32   :  { %v295_v42 = vmin.f32 %v286_v33, 128.0  ;;  %v45_v43 = vmin.f32 %v36_v26, 4.1351666  ;;  %v90_v44 = vmul.f32 0.5, %v1113_v47  ;;  %v37_v15 = vunpack.c.h.bf16 %v1013_v7 }
  0x33   :  { %v260_v34 = vmax.f32 %v251_v36, 0.0  ;;  %v287_v41 = vmax.f32 %v278_v38, 0.0  ;;  %774 = vst [vmem:[%s1243_s3 + $0x18] sm:$0xff] %v756_v39  ;;  %v344_v45 = vrot.slane %v268_v40, %v978_v17  ;;  %v348_v46 = vrot.slane %v268_v40, %v981_v18  ;;  %v781_v39 = vld [vmem:[%s1244_s2 + $0x8] sm:$0xff] }
  0x34   :  { %v434_v24 = vrot.slane %v268_v40, %v984_v19  ;;  %v438_v28 = vrot.slane %v268_v40, %v988_v23  ;;  %v533_v48 = vrot.slane %v295_v42, %v978_v17  ;;  %v537_v49 = vrot.slane %v295_v42, %v981_v18 }
  0x35   :  { %v623_v51 = vrot.slane %v295_v42, %v984_v19  ;;  %v627_v52 = vrot.slane %v295_v42, %v988_v23  ;;  %v269_v37 = vmin.f32 %v260_v34, 128.0  ;;  %v296_v54 = vmin.f32 %v287_v41, 128.0 }
  0x36   :  { %v687_v53 = vsel %vm678_vm0, %v344_v45, %v434_v24  ;;  %v688_v58 = vsel %vm678_vm0, %v348_v46, %v438_v28  ;;  %v884_v62 = vrot.slane %v90_v44, 10  ;;  %v222_v63 = vmul.f32 1.442695, %v45_v43 }
  0x37   :  { %v706_v59 = vsel %vm697_vm1, %v687_v53, %v533_v48  ;;  %v707_v61 = vsel %vm697_vm1, %v688_v58, %v537_v49  ;;  %v352_v2 = vrot.slane %v269_v37, %v978_v17  ;;  %v356_v4 = vrot.slane %v269_v37, %v981_v18  ;;  %v782_v49 = vld [vmem:[%s1244_s2 + $0x10] sm:$0x3] }
  0x38   :  { %v725_v50 = vsel %vm716_vm2, %v706_v59, %v623_v51  ;;  %v726_v1 = vsel %vm716_vm2, %v707_v61, %v627_v52  ;;  %v442_v56 = vrot.slane %v269_v37, %v984_v19  ;;  %v446_v8 = vrot.slane %v269_v37, %v988_v23 }
  0x39   :  { %v757_v5 = vcombine.low %v725_v50, %v726_v1  ;;  %v541_v9 = vrot.slane %v296_v54, %v978_v17  ;;  %v545_v11 = vrot.slane %v296_v54, %v981_v18  ;;  %v631_v12 = vrot.slane %v296_v54, %v984_v19 }
  0x3a   :  { %v635_v60 = vrot.slane %v296_v54, %v988_v23  ;;  %v689_v57 = vsel %vm678_vm0, %v352_v2, %v442_v56  ;;  %v690_v13 = vsel %vm678_vm0, %v356_v4, %v446_v8  ;;  %905 = vpow2.f32 %v222_v63 }
  0x3b   :  { %775 = vst [vmem:[%s1243_s3 + $0x20] sm:$0xff] %v757_v5  ;;  %v708_v20 = vsel %vm697_vm1, %v689_v57, %v541_v9  ;;  %v709_v3 = vsel %vm697_vm1, %v690_v13, %v545_v11  ;;  %v153_v16 = vrot.slane %v36_v26, 6  ;;  %v64_v22 = vrot.slane %v23_v10, 6 }
  0x3c   :  { %v727_v29 = vsel %vm716_vm2, %v708_v20, %v631_v12  ;;  %v728_v14 = vsel %vm716_vm2, %v709_v3, %v635_v60  ;;  %v135_v30 = vadd.f32 %v884_v62, %v1021_v21  ;;  %v46_v31 = vmin.f32 %v37_v15, 4.1351666 }
  0x3d   :  { %v758_v32 = vcombine.low %v727_v29, %v728_v14  ;;  %v82_v33 = vsub.f32 %v23_v10, %v64_v22  ;;  %v38_v7 = vunpack.c.l.bf16 %v29_v55  ;;  %v65_v35 = vrot.slane %v24_v25, 6 }
  0x3e   :  { %v224_v26 = vmul.f32 1.442695, %v46_v31  ;;  %v783_v36 = vunpack.c.l.bf16 %v780_v27  ;;  %v784_v38 = vunpack.c.h.bf16 %v780_v27  ;;  %v171_v40 = vmul.f32 %v153_v16, %v1113_v47 }
  0x3f   :  { %776 = vst [vmem:[%s1243_s3 + $0x28] sm:$0xff] %v758_v32  ;;  %v91_v42 = vmul.f32 0.5, %v82_v33  ;;  %v47_v21 = vmin.f32 %v38_v7, 4.1351666  ;;  %v189_v34 = vrot.slane %v135_v30, 6  ;;  %v83_v41 = vsub.f32 %v24_v25, %v65_v35 }
  0x40   :  { %907 = vpow2.f32 %v224_v26  ;;  %v887_v43 = vmul.f32 -1.442695, %v783_v36  ;;  %v888_v46 = vmul.f32 -1.442695, %v784_v38  ;;  %v785_v24 = vunpack.c.l.bf16 %v781_v39 }
  0x41   :  { %v885_v44 = vrot.slane %v91_v42, 10  ;;  %v226_v45 = vmul.f32 1.442695, %v47_v21  ;;  %v92_v28 = vmul.f32 0.5, %v83_v41  ;;  %v786_v48 = vunpack.c.h.bf16 %v781_v39 }
  0x42   :  { %909 = vpow2.f32 %v887_v43  ;;  %v154_v51 = vrot.slane %v37_v15, 6  ;;  %v207_v53 = vadd.f32 %v189_v34, %v171_v40  ;;  %v889_v54 = vmul.f32 -1.442695, %v785_v24 }
  0x43   :  { %911 = vpow2.f32 %v226_v45  ;;  %v136_v58 = vadd.f32 %v885_v44, %v23_v10  ;;  %v886_v37 = vrot.slane %v92_v28, 10  ;;  %v890_v61 = vmul.f32 -1.442695, %v786_v48 }
  0x44   :  { %v906_v52 = vpop.eup %905  ;;  %913 = vpow2.f32 %v888_v46  ;;  %v787_v62 = vunpack.c.l.bf16 %v782_v49  ;;  %v155_v50 = vrot.slane %v38_v7, 6  ;;  %v172_v2 = vmul.f32 %v154_v51, %v82_v33 }
  0x45   :  { %v234_v59 = vmul.f32 %v906_v52, %v1113_v47  ;;  %v137_v63 = vadd.f32 %v886_v37, %v24_v25  ;;  %v190_v4 = vrot.slane %v136_v58, 6  ;;  %915 = vpow2.f32 %v889_v54 }
  0x46   :  { %917 = vpow2.f32 %v890_v61  ;;  %v891_v8 = vmul.f32 -1.442695, %v787_v62  ;;  %v173_v11 = vmul.f32 %v155_v50, %v83_v41  ;;  %v931_v12 = vmov 1966171168  }
  0x47   :  { %v243_v1 = vmul.f32 0.5, %v234_v59  ;;  %v191_v10 = vrot.slane %v137_v63, 6  ;;  %v824_v60 = vunpack.c.l.s4 %v931_v12  ;;  %v208_v55 = vadd.f32 %v190_v4, %v172_v2 }
  0x48   :  { %919 = vpow2.f32 %v891_v8 }
  0x49   :  { %v252_v5 = vsub.f32 %v207_v53, %v243_v1  ;;  %v279_v56 = vadd.f32 %v243_v1, %v207_v53  ;;  %v209_v25 = vadd.f32 %v191_v10, %v173_v11  ;;  %v825_v14 = vunpack.c.0.s8 %v824_v60 }
  0x4a   :  { %v908_v9 = vpop.eup %907 }
  0x4b   :  { %v261_v57 = vmax.f32 %v252_v5, 0.0  ;;  %v288_v47 = vmax.f32 %v279_v56, 0.0  ;;  %v235_v13 = vmul.f32 %v908_v9, %v82_v33  ;;  %v828_v54 = vsub.s32 %v825_v14, %v967_v6 }
  0x4c   :  { %v910_v15 = vpop.eup %909 }
  0x4d   :  { %v912_v20 = vpop.eup %911  ;;  %v270_v3 = vmin.f32 %v261_v57, 128.0  ;;  %v297_v16 = vmin.f32 %v288_v47, 128.0  ;;  %v244_v22 = vmul.f32 0.5, %v235_v13  ;;  %v803_v29 = vadd.f32 1.0, %v910_v15 }
  0x4e   :  { %v236_v27 = vmul.f32 %v912_v20, %v83_v41  ;;  %v914_v30 = vpop.eup %913 }
  0x4f   :  { %v360_v31 = vrot.slane %v270_v3, %v978_v17  ;;  %v364_v32 = vrot.slane %v270_v3, %v981_v18  ;;  %v450_v7 = vrot.slane %v270_v3, %v984_v19  ;;  %v454_v33 = vrot.slane %v270_v3, %v988_v23  ;;  %v916_v34 = vpop.eup %915 }
  0x50   :  { %v549_v26 = vrot.slane %v297_v16, %v978_v17  ;;  %v553_v35 = vrot.slane %v297_v16, %v981_v18  ;;  %v639_v36 = vrot.slane %v297_v16, %v984_v19  ;;  %v643_v38 = vrot.slane %v297_v16, %v988_v23  ;;  %v918_v46 = vpop.eup %917 }
  0x51   :  { %v691_v39 = vsel %vm678_vm0, %v360_v31, %v450_v7  ;;  %v692_v40 = vsel %vm678_vm0, %v364_v32, %v454_v33  ;;  %v253_v42 = vsub.f32 %v208_v55, %v244_v22  ;;  %v280_v21 = vadd.f32 %v244_v22, %v208_v55 }
  0x52   :  { %v710_v41 = vsel %vm697_vm1, %v691_v39, %v549_v26  ;;  %v711_v43 = vsel %vm697_vm1, %v692_v40, %v553_v35  ;;  %v245_v44 = vmul.f32 0.5, %v236_v27  ;;  %v804_v45 = vadd.f32 1.0, %v914_v30  ;;  %v920_v50 = vpop.eup %919 }
  0x53   :  { %v729_v24 = vsel %vm716_vm2, %v710_v41, %v639_v36  ;;  %v730_v28 = vsel %vm716_vm2, %v711_v43, %v643_v38  ;;  %v262_v48 = vmax.f32 %v253_v42, 0.0  ;;  %v289_v49 = vmax.f32 %v280_v21, 0.0 }
  0x54   :  { %v759_v51 = vcombine.low %v729_v24, %v730_v28  ;;  %v254_v52 = vsub.f32 %v209_v25, %v245_v44  ;;  %v281_v53 = vadd.f32 %v245_v44, %v209_v25  ;;  %921 = vrcp.f32 %v803_v29 }
  0x55   :  { %v271_v58 = vmin.f32 %v262_v48, 128.0  ;;  %v298_v37 = vmin.f32 %v289_v49, 128.0  ;;  %923 = vrcp.f32 %v804_v45  ;;  %v805_v62 = vadd.f32 1.0, %v916_v34 }
  0x56   :  { %777 = vst [vmem:[%s1243_s3 + $0x30] sm:$0xff] %v759_v51  ;;  %v263_v59 = vmax.f32 %v254_v52, 0.0  ;;  %v290_v61 = vmax.f32 %v281_v53, 0.0  ;;  %v806_v63 = vadd.f32 1.0, %v918_v46  ;;  %v807_v13 = vadd.f32 1.0, %v920_v50 }
  0x57   :  { %v368_v1 = vrot.slane %v271_v58, %v978_v17  ;;  %v372_v2 = vrot.slane %v271_v58, %v981_v18  ;;  %v458_v4 = vrot.slane %v271_v58, %v984_v19  ;;  %v462_v5 = vrot.slane %v271_v58, %v988_v23 }
  0x58   :  { %v557_v56 = vrot.slane %v298_v37, %v978_v17  ;;  %v561_v6 = vrot.slane %v298_v37, %v981_v18  ;;  %v647_v8 = vrot.slane %v298_v37, %v984_v19  ;;  %v651_v9 = vrot.slane %v298_v37, %v988_v23 }
  0x59   :  { %v693_v11 = vsel %vm678_vm0, %v368_v1, %v458_v4  ;;  %v694_v10 = vsel %vm678_vm0, %v372_v2, %v462_v5  ;;  %v272_v12 = vmin.f32 %v263_v59, 128.0  ;;  %v299_v60 = vmin.f32 %v290_v61, 128.0 }
  0x5a   :  { %v712_v57 = vsel %vm697_vm1, %v693_v11, %v557_v56  ;;  %v713_v47 = vsel %vm697_vm1, %v694_v10, %v561_v6  ;;  %925 = vrcp.f32 %v805_v62 }
  0x5b   :  { %v731_v15 = vsel %vm716_vm2, %v712_v57, %v647_v8  ;;  %v732_v55 = vsel %vm716_vm2, %v713_v47, %v651_v9  ;;  %v376_v20 = vrot.slane %v272_v12, %v978_v17  ;;  %v380_v3 = vrot.slane %v272_v12, %v981_v18 }
  0x5c   :  { %v760_v16 = vcombine.low %v731_v15, %v732_v55  ;;  %v466_v22 = vrot.slane %v272_v12, %v984_v19  ;;  %v470_v25 = vrot.slane %v272_v12, %v988_v23  ;;  %v565_v27 = vrot.slane %v299_v60, %v978_v17 }
  0x5d   :  { %v569_v29 = vrot.slane %v299_v60, %v981_v18  ;;  %v655_v14 = vrot.slane %v299_v60, %v984_v19  ;;  %v659_v30 = vrot.slane %v299_v60, %v988_v23  ;;  %927 = vrcp.f32 %v806_v63 }
  0x5e   :  { %v922_v31 = vpop.eup %921  ;;  %778 = vst [vmem:[%s1243_s3 + $0x38] sm:$0xff] %v760_v16  ;;  %v695_v32 = vsel %vm678_vm0, %v376_v20, %v466_v22  ;;  %v696_v7 = vsel %vm678_vm0, %v380_v3, %v470_v25  ;;  %929 = vrcp.f32 %v807_v13 }
  0x5f   :  { %v924_v33 = vpop.eup %923  ;;  %v714_v17 = vsel %vm697_vm1, %v695_v32, %v565_v27  ;;  %v715_v18 = vsel %vm697_vm1, %v696_v7, %v569_v29  ;;  %v829_v26 = vrot.slane %v922_v31, %v828_v54 }
  0x60   :  { %v733_v19 = vsel %vm716_vm2, %v714_v17, %v655_v14  ;;  %v734_v23 = vsel %vm716_vm2, %v715_v18, %v659_v30  ;;  %v836_v35 = vrot.slane %v924_v33, %v828_v54 }
  0x61   :  { %v761_v36 = vcombine.low %v733_v19, %v734_v23 }
  0x62   :  { %v837_v38 = vcombine.low %v829_v26, %v836_v35 }
  0x63   :  { %779 = vst [vmem:[%s1243_s3 + $0x40] sm:$0xff] %v761_v36 }
  0x64   :  { %v926_v39 = vpop.eup %925  ;;  %863 = vst [vmem:[%s1245_s4] sm:$0xff] %v837_v38 }
  0x65   :  { %v844_v40 = vrot.slane %v926_v39, %v828_v54 }
  0x67   :  { %v928_v42 = vpop.eup %927 }
  0x68   :  { %v930_v21 = vpop.eup %929  ;;  %v851_v34 = vrot.slane %v928_v42, %v828_v54 }
  0x69   :  { %v859_v41 = vrot.slane %v930_v21, %v828_v54 }
  0x6a   :  { %v852_v43 = vcombine.low %v844_v40, %v851_v34 }
  0x6b   :  { %869 = vst.msk [vmem:[%s1245_s4 + $0x10] sm:$0x3] %vm867_vm3, %v859_v41 }
  0x6c   :  { %864 = vst [vmem:[%s1245_s4 + $0x8] sm:$0xff] %v852_v43 }

</bundles_post_ra>
